<compile_context>
chip_gen: v7x
topology: tpu7x:2x2x1
jax: 0.10.0
libtpu: 0.0.40
codegen_flags: <defaults>
</compile_context>

<pallas_src>
import functools

import jax
import jax.numpy as jnp
from jax.experimental import pallas as pl
from jax.experimental.pallas import tpu as pltpu


def _shortcut_conv3x3_kernel(x_ref, w_ref, b_ref, m_ref, o_ref, *, W):
    """Fused  out = x + conv3x3(x) + bias  on a lane-dense (BN, C, H*W) slab.

    x_ref : (BN, Cin, HW)          activations, HW on the lane axis
    w_ref : (3, 3, Cin, Cout, 1)   conv weights, Cout on the sublane axis
    b_ref : (Cout, 1)              conv bias
    m_ref : (9, 1, 1, HW)          per-tap validity masks (1.0 inside image)
    o_ref : (BN, Cout, HW)         output (Cin == Cout for the residual)
    """
    BN, Cin, HW = x_ref.shape
    Cout = o_ref.shape[1]

    x = x_ref[...].astype(jnp.float32)                  # single input read
    acc = jnp.zeros((BN, Cout, HW), jnp.float32)

    for kh in range(3):
        for kw in range(3):
            dh, dw = kh - 1, kw - 1
            s = dh * W + dw                             # flat tap offset
            tap = kh * 3 + kw
            # xs[p] = x[p + s]  (wrap-around killed by the validity mask)
            xs = x if s == 0 else pltpu.roll(x, shift=(-s) % HW, axis=2)
            xs = xs * m_ref[tap]                        # (1, 1, HW) broadcast
            # Channel contraction on the VPU (C is tiny; MXU would be idle).
            for ci in range(Cin):
                wv = w_ref[kh, kw, ci, :, :]            # (Cout, 1)
                acc = acc + wv[None, :, :] * xs[:, ci:ci + 1, :]

    out = x + acc + b_ref[...][None, :, :]              # residual + bias
    o_ref[...] = out.astype(o_ref.dtype)


def shortcut_block(x_nchw, weight, bias):
    """output = x + conv3x3(x)  (ShortcutBlock(Conv2d(C, C, 3, padding=1))).

    x_nchw : (N, C, H, W) float32
    weight : (Cout, Cin, 3, 3) float32 (PyTorch conv weight layout)
    bias   : (Cout,) float32
    """
    N, C, H, W = x_nchw.shape
    Cout, Cin, KH, KW = weight.shape
    assert (KH, KW) == (3, 3) and Cin == C and Cout == C, "residual needs Cin==Cout, 3x3"
    HW = H * W

    # Free, contiguous reshape: NCHW -> (N, C, H*W); H*W lands on the lane axis.
    x3 = x_nchw.reshape(N, C, HW)
    # Tiny weight relayout: (Cout, Cin, kh, kw) -> (kh, kw, Cin, Cout, 1).
    w5 = jnp.transpose(weight, (2, 3, 1, 0)).reshape(3, 3, Cin, Cout, 1)
    b2 = bias.reshape(Cout, 1)

    # 9 per-tap validity masks (zero where the tap falls outside the image).
    hh = jnp.arange(H).reshape(H, 1)
    ww = jnp.arange(W).reshape(1, W)
    taps = []
    for kh in range(3):
        for kw in range(3):
            dh, dw = kh - 1, kw - 1
            m = ((hh + dh >= 0) & (hh + dh < H) & (ww + dw >= 0) & (ww + dw < W))
            taps.append(m.reshape(1, 1, 1, HW))
    masks = jnp.concatenate(taps, axis=0).astype(jnp.float32)   # (9, 1, 1, HW)

    bn = N                      # all batch elements in one block (tiny slabs)
    grid = (N // bn,)

    kernel = functools.partial(_shortcut_conv3x3_kernel, W=W)

    out3 = pl.pallas_call(
        kernel,
        out_shape=jax.ShapeDtypeStruct((N, Cout, HW), x_nchw.dtype),
        grid_spec=pltpu.PrefetchScalarGridSpec(
            num_scalar_prefetch=0,
            grid=grid,
            in_specs=[
                pl.BlockSpec((bn, Cin, HW), lambda n: (n, 0, 0)),
                pl.BlockSpec((3, 3, Cin, Cout, 1), lambda n: (0, 0, 0, 0, 0)),
                pl.BlockSpec((Cout, 1), lambda n: (0, 0)),
                pl.BlockSpec((9, 1, 1, HW), lambda n: (0, 0, 0, 0)),
            ],
            out_specs=pl.BlockSpec((bn, Cout, HW), lambda n: (n, 0, 0)),
        ),
        compiler_params=pltpu.CompilerParams(
            dimension_semantics=("parallel",)),
    )(x3, w5, b2, masks)

    # Free reshape back to NCHW.
    return out3.reshape(N, Cout, H, W)


def _reference(x_nchw, weight, bias):
    """Pure-JAX reference: x + conv2d(x) (NCHW, same padding)."""
    conv = jax.lax.conv_general_dilated(
        x_nchw, weight,
        window_strides=(1, 1), padding="SAME",
        dimension_numbers=("NCHW", "OIHW", "NCHW"))
    conv = conv + bias.reshape(1, -1, 1, 1)
    return x_nchw + conv


if __name__ == "__main__":
    key = jax.random.PRNGKey(0)
    kx, kw, kb = jax.random.split(key, 3)

    N, C, H, W = 2, 4, 16, 16
    x = jax.random.normal(kx, (N, C, H, W), dtype=jnp.float32)

    # Conv2d(C, C, kernel_size=3, padding=1) parameters.
    fan_in = C * 3 * 3
    bound = 1.0 / (fan_in ** 0.5)
    weight = jax.random.uniform(kw, (C, C, 3, 3), jnp.float32, -bound, bound)
    bias = jax.random.uniform(kb, (C,), jnp.float32, -bound, bound)

    out = shortcut_block(x, weight, bias)
    out = jax.block_until_ready(out)

    ref = _reference(x, weight, bias)
    assert out.shape == (N, C, H, W)
    assert jnp.max(jnp.abs(out - ref)) < 1e-4

    print("KERNEL_OK")
</pallas_src>

<mosaic_0001>
module attributes {stable_mosaic.version = 11 : i64} {
  func.func @_shortcut_conv3x3_kernel(%arg0: i32, %arg1: memref<2x4x256xf32, #tpu.memory_space<vmem>>, %arg2: memref<3x3x4x4x1xf32, #tpu.memory_space<vmem>>, %arg3: memref<4x1xf32, #tpu.memory_space<vmem>>, %arg4: memref<9x1x1x256xf32, #tpu.memory_space<vmem>>, %arg5: memref<2x4x256xf32, #tpu.memory_space<vmem>>) attributes {dimension_semantics = [#tpu.dimension_semantics<parallel>], iteration_bounds = array<i64: 1>, scalar_prefetch = 0 : i64, scratch_operands = 0 : i64, tpu.core_type = #tpu.core_type<tc>, window_params = [{transform_indices = @transform_0, window_bounds = array<i64: 2, 4, 256>}, {pipeline_mode = #tpu.pipeline_mode<synchronous>, transform_indices = @transform_1, window_bounds = array<i64: 3, 3, 4, 4, 1>}, {pipeline_mode = #tpu.pipeline_mode<synchronous>, transform_indices = @transform_2, window_bounds = array<i64: 4, 1>}, {pipeline_mode = #tpu.pipeline_mode<synchronous>, transform_indices = @transform_3, window_bounds = array<i64: 9, 1, 1, 256>}, {transform_indices = @transform_4, window_bounds = array<i64: 2, 4, 256>}]} {
    %c0 = arith.constant 0 : index
    %c0_0 = arith.constant 0 : index
    %c0_1 = arith.constant 0 : index
    %0 = vector.load %arg1[%c0, %c0_0, %c0_1] : memref<2x4x256xf32, #tpu.memory_space<vmem>>, vector<2x4x256xf32>
    %cst = arith.constant 0.000000e+00 : f32
    %1 = vector.broadcast %cst : f32 to vector<2x4x256xf32>
    %c17_i32 = arith.constant 17 : i32
    %2 = tpu.dynamic_rotate %0 by %c17_i32 dim 2 : vector<2x4x256xf32>, i32 -> vector<2x4x256xf32>
    %c0_2 = arith.constant 0 : index
    %c0_3 = arith.constant 0 : index
    %c0_4 = arith.constant 0 : index
    %c0_5 = arith.constant 0 : index
    %3 = vector.load %arg4[%c0_2, %c0_3, %c0_4, %c0_5] : memref<9x1x1x256xf32, #tpu.memory_space<vmem>>, vector<1x1x1x256xf32>
    %4 = vector.shape_cast %3 : vector<1x1x1x256xf32> to vector<1x1x256xf32>
    %5 = vector.broadcast %4 : vector<1x1x256xf32> to vector<2x4x256xf32>
    %6 = arith.mulf %2, %5 : vector<2x4x256xf32>
    %c0_6 = arith.constant 0 : index
    %c0_7 = arith.constant 0 : index
    %c0_8 = arith.constant 0 : index
    %c0_9 = arith.constant 0 : index
    %c0_10 = arith.constant 0 : index
    %7 = vector.load %arg2[%c0_6, %c0_7, %c0_8, %c0_9, %c0_10] : memref<3x3x4x4x1xf32, #tpu.memory_space<vmem>>, vector<1x1x1x4x1xf32>
    %8 = vector.shape_cast %7 : vector<1x1x1x4x1xf32> to vector<4x1xf32>
    %9 = vector.shape_cast %8 : vector<4x1xf32> to vector<1x4x1xf32>
    %10 = vector.extract_strided_slice %6 {offsets = [0, 0, 0], sizes = [2, 1, 256], strides = [1, 1, 1]} : vector<2x4x256xf32> to vector<2x1x256xf32>
    %11 = vector.broadcast %9 : vector<1x4x1xf32> to vector<2x4x256xf32>
    %12 = vector.broadcast %10 : vector<2x1x256xf32> to vector<2x4x256xf32>
    %13 = arith.mulf %11, %12 : vector<2x4x256xf32>
    %14 = arith.addf %1, %13 : vector<2x4x256xf32>
    %c0_11 = arith.constant 0 : index
    %c0_12 = arith.constant 0 : index
    %c1 = arith.constant 1 : index
    %c0_13 = arith.constant 0 : index
    %c0_14 = arith.constant 0 : index
    %15 = vector.load %arg2[%c0_11, %c0_12, %c1, %c0_13, %c0_14] : memref<3x3x4x4x1xf32, #tpu.memory_space<vmem>>, vector<1x1x1x4x1xf32>
    %16 = vector.shape_cast %15 : vector<1x1x1x4x1xf32> to vector<4x1xf32>
    %17 = vector.shape_cast %16 : vector<4x1xf32> to vector<1x4x1xf32>
    %18 = vector.extract_strided_slice %6 {offsets = [0, 1, 0], sizes = [2, 1, 256], strides = [1, 1, 1]} : vector<2x4x256xf32> to vector<2x1x256xf32>
    %19 = vector.broadcast %17 : vector<1x4x1xf32> to vector<2x4x256xf32>
    %20 = vector.broadcast %18 : vector<2x1x256xf32> to vector<2x4x256xf32>
    %21 = arith.mulf %19, %20 : vector<2x4x256xf32>
    %22 = arith.addf %14, %21 : vector<2x4x256xf32>
    %c0_15 = arith.constant 0 : index
    %c0_16 = arith.constant 0 : index
    %c2 = arith.constant 2 : index
    %c0_17 = arith.constant 0 : index
    %c0_18 = arith.constant 0 : index
    %23 = vector.load %arg2[%c0_15, %c0_16, %c2, %c0_17, %c0_18] : memref<3x3x4x4x1xf32, #tpu.memory_space<vmem>>, vector<1x1x1x4x1xf32>
    %24 = vector.shape_cast %23 : vector<1x1x1x4x1xf32> to vector<4x1xf32>
    %25 = vector.shape_cast %24 : vector<4x1xf32> to vector<1x4x1xf32>
    %26 = vector.extract_strided_slice %6 {offsets = [0, 2, 0], sizes = [2, 1, 256], strides = [1, 1, 1]} : vector<2x4x256xf32> to vector<2x1x256xf32>
    %27 = vector.broadcast %25 : vector<1x4x1xf32> to vector<2x4x256xf32>
    %28 = vector.broadcast %26 : vector<2x1x256xf32> to vector<2x4x256xf32>
    %29 = arith.mulf %27, %28 : vector<2x4x256xf32>
    %30 = arith.addf %22, %29 : vector<2x4x256xf32>
    %c0_19 = arith.constant 0 : index
    %c0_20 = arith.constant 0 : index
    %c3 = arith.constant 3 : index
    %c0_21 = arith.constant 0 : index
    %c0_22 = arith.constant 0 : index
    %31 = vector.load %arg2[%c0_19, %c0_20, %c3, %c0_21, %c0_22] : memref<3x3x4x4x1xf32, #tpu.memory_space<vmem>>, vector<1x1x1x4x1xf32>
    %32 = vector.shape_cast %31 : vector<1x1x1x4x1xf32> to vector<4x1xf32>
    %33 = vector.shape_cast %32 : vector<4x1xf32> to vector<1x4x1xf32>
    %34 = vector.extract_strided_slice %6 {offsets = [0, 3, 0], sizes = [2, 1, 256], strides = [1, 1, 1]} : vector<2x4x256xf32> to vector<2x1x256xf32>
    %35 = vector.broadcast %33 : vector<1x4x1xf32> to vector<2x4x256xf32>
    %36 = vector.broadcast %34 : vector<2x1x256xf32> to vector<2x4x256xf32>
    %37 = arith.mulf %35, %36 : vector<2x4x256xf32>
    %38 = arith.addf %30, %37 : vector<2x4x256xf32>
    %c16_i32 = arith.constant 16 : i32
    %39 = tpu.dynamic_rotate %0 by %c16_i32 dim 2 : vector<2x4x256xf32>, i32 -> vector<2x4x256xf32>
    %c1_23 = arith.constant 1 : index
    %c0_24 = arith.constant 0 : index
    %c0_25 = arith.constant 0 : index
    %c0_26 = arith.constant 0 : index
    %40 = vector.load %arg4[%c1_23, %c0_24, %c0_25, %c0_26] : memref<9x1x1x256xf32, #tpu.memory_space<vmem>>, vector<1x1x1x256xf32>
    %41 = vector.shape_cast %40 : vector<1x1x1x256xf32> to vector<1x1x256xf32>
    %42 = vector.broadcast %41 : vector<1x1x256xf32> to vector<2x4x256xf32>
    %43 = arith.mulf %39, %42 : vector<2x4x256xf32>
    %c0_27 = arith.constant 0 : index
    %c1_28 = arith.constant 1 : index
    %c0_29 = arith.constant 0 : index
    %c0_30 = arith.constant 0 : index
    %c0_31 = arith.constant 0 : index
    %44 = vector.load %arg2[%c0_27, %c1_28, %c0_29, %c0_30, %c0_31] : memref<3x3x4x4x1xf32, #tpu.memory_space<vmem>>, vector<1x1x1x4x1xf32>
    %45 = vector.shape_cast %44 : vector<1x1x1x4x1xf32> to vector<4x1xf32>
    %46 = vector.shape_cast %45 : vector<4x1xf32> to vector<1x4x1xf32>
    %47 = vector.extract_strided_slice %43 {offsets = [0, 0, 0], sizes = [2, 1, 256], strides = [1, 1, 1]} : vector<2x4x256xf32> to vector<2x1x256xf32>
    %48 = vector.broadcast %46 : vector<1x4x1xf32> to vector<2x4x256xf32>
    %49 = vector.broadcast %47 : vector<2x1x256xf32> to vector<2x4x256xf32>
    %50 = arith.mulf %48, %49 : vector<2x4x256xf32>
    %51 = arith.addf %38, %50 : vector<2x4x256xf32>
    %c0_32 = arith.constant 0 : index
    %c1_33 = arith.constant 1 : index
    %c1_34 = arith.constant 1 : index
    %c0_35 = arith.constant 0 : index
    %c0_36 = arith.constant 0 : index
    %52 = vector.load %arg2[%c0_32, %c1_33, %c1_34, %c0_35, %c0_36] : memref<3x3x4x4x1xf32, #tpu.memory_space<vmem>>, vector<1x1x1x4x1xf32>
    %53 = vector.shape_cast %52 : vector<1x1x1x4x1xf32> to vector<4x1xf32>
    %54 = vector.shape_cast %53 : vector<4x1xf32> to vector<1x4x1xf32>
    %55 = vector.extract_strided_slice %43 {offsets = [0, 1, 0], sizes = [2, 1, 256], strides = [1, 1, 1]} : vector<2x4x256xf32> to vector<2x1x256xf32>
    %56 = vector.broadcast %54 : vector<1x4x1xf32> to vector<2x4x256xf32>
    %57 = vector.broadcast %55 : vector<2x1x256xf32> to vector<2x4x256xf32>
    %58 = arith.mulf %56, %57 : vector<2x4x256xf32>
    %59 = arith.addf %51, %58 : vector<2x4x256xf32>
    %c0_37 = arith.constant 0 : index
    %c1_38 = arith.constant 1 : index
    %c2_39 = arith.constant 2 : index
    %c0_40 = arith.constant 0 : index
    %c0_41 = arith.constant 0 : index
    %60 = vector.load %arg2[%c0_37, %c1_38, %c2_39, %c0_40, %c0_41] : memref<3x3x4x4x1xf32, #tpu.memory_space<vmem>>, vector<1x1x1x4x1xf32>
    %61 = vector.shape_cast %60 : vector<1x1x1x4x1xf32> to vector<4x1xf32>
    %62 = vector.shape_cast %61 : vector<4x1xf32> to vector<1x4x1xf32>
    %63 = vector.extract_strided_slice %43 {offsets = [0, 2, 0], sizes = [2, 1, 256], strides = [1, 1, 1]} : vector<2x4x256xf32> to vector<2x1x256xf32>
    %64 = vector.broadcast %62 : vector<1x4x1xf32> to vector<2x4x256xf32>
    %65 = vector.broadcast %63 : vector<2x1x256xf32> to vector<2x4x256xf32>
    %66 = arith.mulf %64, %65 : vector<2x4x256xf32>
    %67 = arith.addf %59, %66 : vector<2x4x256xf32>
    %c0_42 = arith.constant 0 : index
    %c1_43 = arith.constant 1 : index
    %c3_44 = arith.constant 3 : index
    %c0_45 = arith.constant 0 : index
    %c0_46 = arith.constant 0 : index
    %68 = vector.load %arg2[%c0_42, %c1_43, %c3_44, %c0_45, %c0_46] : memref<3x3x4x4x1xf32, #tpu.memory_space<vmem>>, vector<1x1x1x4x1xf32>
    %69 = vector.shape_cast %68 : vector<1x1x1x4x1xf32> to vector<4x1xf32>
    %70 = vector.shape_cast %69 : vector<4x1xf32> to vector<1x4x1xf32>
    %71 = vector.extract_strided_slice %43 {offsets = [0, 3, 0], sizes = [2, 1, 256], strides = [1, 1, 1]} : vector<2x4x256xf32> to vector<2x1x256xf32>
    %72 = vector.broadcast %70 : vector<1x4x1xf32> to vector<2x4x256xf32>
    %73 = vector.broadcast %71 : vector<2x1x256xf32> to vector<2x4x256xf32>
    %74 = arith.mulf %72, %73 : vector<2x4x256xf32>
    %75 = arith.addf %67, %74 : vector<2x4x256xf32>
    %c15_i32 = arith.constant 15 : i32
    %76 = tpu.dynamic_rotate %0 by %c15_i32 dim 2 : vector<2x4x256xf32>, i32 -> vector<2x4x256xf32>
    %c2_47 = arith.constant 2 : index
    %c0_48 = arith.constant 0 : index
    %c0_49 = arith.constant 0 : index
    %c0_50 = arith.constant 0 : index
    %77 = vector.load %arg4[%c2_47, %c0_48, %c0_49, %c0_50] : memref<9x1x1x256xf32, #tpu.memory_space<vmem>>, vector<1x1x1x256xf32>
    %78 = vector.shape_cast %77 : vector<1x1x1x256xf32> to vector<1x1x256xf32>
    %79 = vector.broadcast %78 : vector<1x1x256xf32> to vector<2x4x256xf32>
    %80 = arith.mulf %76, %79 : vector<2x4x256xf32>
    %c0_51 = arith.constant 0 : index
    %c2_52 = arith.constant 2 : index
    %c0_53 = arith.constant 0 : index
    %c0_54 = arith.constant 0 : index
    %c0_55 = arith.constant 0 : index
    %81 = vector.load %arg2[%c0_51, %c2_52, %c0_53, %c0_54, %c0_55] : memref<3x3x4x4x1xf32, #tpu.memory_space<vmem>>, vector<1x1x1x4x1xf32>
    %82 = vector.shape_cast %81 : vector<1x1x1x4x1xf32> to vector<4x1xf32>
    %83 = vector.shape_cast %82 : vector<4x1xf32> to vector<1x4x1xf32>
    %84 = vector.extract_strided_slice %80 {offsets = [0, 0, 0], sizes = [2, 1, 256], strides = [1, 1, 1]} : vector<2x4x256xf32> to vector<2x1x256xf32>
    %85 = vector.broadcast %83 : vector<1x4x1xf32> to vector<2x4x256xf32>
    %86 = vector.broadcast %84 : vector<2x1x256xf32> to vector<2x4x256xf32>
    %87 = arith.mulf %85, %86 : vector<2x4x256xf32>
    %88 = arith.addf %75, %87 : vector<2x4x256xf32>
    %c0_56 = arith.constant 0 : index
    %c2_57 = arith.constant 2 : index
    %c1_58 = arith.constant 1 : index
    %c0_59 = arith.constant 0 : index
    %c0_60 = arith.constant 0 : index
    %89 = vector.load %arg2[%c0_56, %c2_57, %c1_58, %c0_59, %c0_60] : memref<3x3x4x4x1xf32, #tpu.memory_space<vmem>>, vector<1x1x1x4x1xf32>
    %90 = vector.shape_cast %89 : vector<1x1x1x4x1xf32> to vector<4x1xf32>
    %91 = vector.shape_cast %90 : vector<4x1xf32> to vector<1x4x1xf32>
    %92 = vector.extract_strided_slice %80 {offsets = [0, 1, 0], sizes = [2, 1, 256], strides = [1, 1, 1]} : vector<2x4x256xf32> to vector<2x1x256xf32>
    %93 = vector.broadcast %91 : vector<1x4x1xf32> to vector<2x4x256xf32>
    %94 = vector.broadcast %92 : vector<2x1x256xf32> to vector<2x4x256xf32>
    %95 = arith.mulf %93, %94 : vector<2x4x256xf32>
    %96 = arith.addf %88, %95 : vector<2x4x256xf32>
    %c0_61 = arith.constant 0 : index
    %c2_62 = arith.constant 2 : index
    %c2_63 = arith.constant 2 : index
    %c0_64 = arith.constant 0 : index
    %c0_65 = arith.constant 0 : index
    %97 = vector.load %arg2[%c0_61, %c2_62, %c2_63, %c0_64, %c0_65] : memref<3x3x4x4x1xf32, #tpu.memory_space<vmem>>, vector<1x1x1x4x1xf32>
    %98 = vector.shape_cast %97 : vector<1x1x1x4x1xf32> to vector<4x1xf32>
    %99 = vector.shape_cast %98 : vector<4x1xf32> to vector<1x4x1xf32>
    %100 = vector.extract_strided_slice %80 {offsets = [0, 2, 0], sizes = [2, 1, 256], strides = [1, 1, 1]} : vector<2x4x256xf32> to vector<2x1x256xf32>
    %101 = vector.broadcast %99 : vector<1x4x1xf32> to vector<2x4x256xf32>
    %102 = vector.broadcast %100 : vector<2x1x256xf32> to vector<2x4x256xf32>
    %103 = arith.mulf %101, %102 : vector<2x4x256xf32>
    %104 = arith.addf %96, %103 : vector<2x4x256xf32>
    %c0_66 = arith.constant 0 : index
    %c2_67 = arith.constant 2 : index
    %c3_68 = arith.constant 3 : index
    %c0_69 = arith.constant 0 : index
    %c0_70 = arith.constant 0 : index
    %105 = vector.load %arg2[%c0_66, %c2_67, %c3_68, %c0_69, %c0_70] : memref<3x3x4x4x1xf32, #tpu.memory_space<vmem>>, vector<1x1x1x4x1xf32>
    %106 = vector.shape_cast %105 : vector<1x1x1x4x1xf32> to vector<4x1xf32>
    %107 = vector.shape_cast %106 : vector<4x1xf32> to vector<1x4x1xf32>
    %108 = vector.extract_strided_slice %80 {offsets = [0, 3, 0], sizes = [2, 1, 256], strides = [1, 1, 1]} : vector<2x4x256xf32> to vector<2x1x256xf32>
    %109 = vector.broadcast %107 : vector<1x4x1xf32> to vector<2x4x256xf32>
    %110 = vector.broadcast %108 : vector<2x1x256xf32> to vector<2x4x256xf32>
    %111 = arith.mulf %109, %110 : vector<2x4x256xf32>
    %112 = arith.addf %104, %111 : vector<2x4x256xf32>
    %c1_i32 = arith.constant 1 : i32
    %113 = tpu.dynamic_rotate %0 by %c1_i32 dim 2 : vector<2x4x256xf32>, i32 -> vector<2x4x256xf32>
    %c3_71 = arith.constant 3 : index
    %c0_72 = arith.constant 0 : index
    %c0_73 = arith.constant 0 : index
    %c0_74 = arith.constant 0 : index
    %114 = vector.load %arg4[%c3_71, %c0_72, %c0_73, %c0_74] : memref<9x1x1x256xf32, #tpu.memory_space<vmem>>, vector<1x1x1x256xf32>
    %115 = vector.shape_cast %114 : vector<1x1x1x256xf32> to vector<1x1x256xf32>
    %116 = vector.broadcast %115 : vector<1x1x256xf32> to vector<2x4x256xf32>
    %117 = arith.mulf %113, %116 : vector<2x4x256xf32>
    %c1_75 = arith.constant 1 : index
    %c0_76 = arith.constant 0 : index
    %c0_77 = arith.constant 0 : index
    %c0_78 = arith.constant 0 : index
    %c0_79 = arith.constant 0 : index
    %118 = vector.load %arg2[%c1_75, %c0_76, %c0_77, %c0_78, %c0_79] : memref<3x3x4x4x1xf32, #tpu.memory_space<vmem>>, vector<1x1x1x4x1xf32>
    %119 = vector.shape_cast %118 : vector<1x1x1x4x1xf32> to vector<4x1xf32>
    %120 = vector.shape_cast %119 : vector<4x1xf32> to vector<1x4x1xf32>
    %121 = vector.extract_strided_slice %117 {offsets = [0, 0, 0], sizes = [2, 1, 256], strides = [1, 1, 1]} : vector<2x4x256xf32> to vector<2x1x256xf32>
    %122 = vector.broadcast %120 : vector<1x4x1xf32> to vector<2x4x256xf32>
    %123 = vector.broadcast %121 : vector<2x1x256xf32> to vector<2x4x256xf32>
    %124 = arith.mulf %122, %123 : vector<2x4x256xf32>
    %125 = arith.addf %112, %124 : vector<2x4x256xf32>
    %c1_80 = arith.constant 1 : index
    %c0_81 = arith.constant 0 : index
    %c1_82 = arith.constant 1 : index
    %c0_83 = arith.constant 0 : index
    %c0_84 = arith.constant 0 : index
    %126 = vector.load %arg2[%c1_80, %c0_81, %c1_82, %c0_83, %c0_84] : memref<3x3x4x4x1xf32, #tpu.memory_space<vmem>>, vector<1x1x1x4x1xf32>
    %127 = vector.shape_cast %126 : vector<1x1x1x4x1xf32> to vector<4x1xf32>
    %128 = vector.shape_cast %127 : vector<4x1xf32> to vector<1x4x1xf32>
    %129 = vector.extract_strided_slice %117 {offsets = [0, 1, 0], sizes = [2, 1, 256], strides = [1, 1, 1]} : vector<2x4x256xf32> to vector<2x1x256xf32>
    %130 = vector.broadcast %128 : vector<1x4x1xf32> to vector<2x4x256xf32>
    %131 = vector.broadcast %129 : vector<2x1x256xf32> to vector<2x4x256xf32>
    %132 = arith.mulf %130, %131 : vector<2x4x256xf32>
    %133 = arith.addf %125, %132 : vector<2x4x256xf32>
    %c1_85 = arith.constant 1 : index
    %c0_86 = arith.constant 0 : index
    %c2_87 = arith.constant 2 : index
    %c0_88 = arith.constant 0 : index
    %c0_89 = arith.constant 0 : index
    %134 = vector.load %arg2[%c1_85, %c0_86, %c2_87, %c0_88, %c0_89] : memref<3x3x4x4x1xf32, #tpu.memory_space<vmem>>, vector<1x1x1x4x1xf32>
    %135 = vector.shape_cast %134 : vector<1x1x1x4x1xf32> to vector<4x1xf32>
    %136 = vector.shape_cast %135 : vector<4x1xf32> to vector<1x4x1xf32>
    %137 = vector.extract_strided_slice %117 {offsets = [0, 2, 0], sizes = [2, 1, 256], strides = [1, 1, 1]} : vector<2x4x256xf32> to vector<2x1x256xf32>
    %138 = vector.broadcast %136 : vector<1x4x1xf32> to vector<2x4x256xf32>
    %139 = vector.broadcast %137 : vector<2x1x256xf32> to vector<2x4x256xf32>
    %140 = arith.mulf %138, %139 : vector<2x4x256xf32>
    %141 = arith.addf %133, %140 : vector<2x4x256xf32>
    %c1_90 = arith.constant 1 : index
    %c0_91 = arith.constant 0 : index
    %c3_92 = arith.constant 3 : index
    %c0_93 = arith.constant 0 : index
    %c0_94 = arith.constant 0 : index
    %142 = vector.load %arg2[%c1_90, %c0_91, %c3_92, %c0_93, %c0_94] : memref<3x3x4x4x1xf32, #tpu.memory_space<vmem>>, vector<1x1x1x4x1xf32>
    %143 = vector.shape_cast %142 : vector<1x1x1x4x1xf32> to vector<4x1xf32>
    %144 = vector.shape_cast %143 : vector<4x1xf32> to vector<1x4x1xf32>
    %145 = vector.extract_strided_slice %117 {offsets = [0, 3, 0], sizes = [2, 1, 256], strides = [1, 1, 1]} : vector<2x4x256xf32> to vector<2x1x256xf32>
    %146 = vector.broadcast %144 : vector<1x4x1xf32> to vector<2x4x256xf32>
    %147 = vector.broadcast %145 : vector<2x1x256xf32> to vector<2x4x256xf32>
    %148 = arith.mulf %146, %147 : vector<2x4x256xf32>
    %149 = arith.addf %141, %148 : vector<2x4x256xf32>
    %c4 = arith.constant 4 : index
    %c0_95 = arith.constant 0 : index
    %c0_96 = arith.constant 0 : index
    %c0_97 = arith.constant 0 : index
    %150 = vector.load %arg4[%c4, %c0_95, %c0_96, %c0_97] : memref<9x1x1x256xf32, #tpu.memory_space<vmem>>, vector<1x1x1x256xf32>
    %151 = vector.shape_cast %150 : vector<1x1x1x256xf32> to vector<1x1x256xf32>
    %152 = vector.broadcast %151 : vector<1x1x256xf32> to vector<2x4x256xf32>
    %153 = arith.mulf %0, %152 : vector<2x4x256xf32>
    %c1_98 = arith.constant 1 : index
    %c1_99 = arith.constant 1 : index
    %c0_100 = arith.constant 0 : index
    %c0_101 = arith.constant 0 : index
    %c0_102 = arith.constant 0 : index
    %154 = vector.load %arg2[%c1_98, %c1_99, %c0_100, %c0_101, %c0_102] : memref<3x3x4x4x1xf32, #tpu.memory_space<vmem>>, vector<1x1x1x4x1xf32>
    %155 = vector.shape_cast %154 : vector<1x1x1x4x1xf32> to vector<4x1xf32>
    %156 = vector.shape_cast %155 : vector<4x1xf32> to vector<1x4x1xf32>
    %157 = vector.extract_strided_slice %153 {offsets = [0, 0, 0], sizes = [2, 1, 256], strides = [1, 1, 1]} : vector<2x4x256xf32> to vector<2x1x256xf32>
    %158 = vector.broadcast %156 : vector<1x4x1xf32> to vector<2x4x256xf32>
    %159 = vector.broadcast %157 : vector<2x1x256xf32> to vector<2x4x256xf32>
    %160 = arith.mulf %158, %159 : vector<2x4x256xf32>
    %161 = arith.addf %149, %160 : vector<2x4x256xf32>
    %c1_103 = arith.constant 1 : index
    %c1_104 = arith.constant 1 : index
    %c1_105 = arith.constant 1 : index
    %c0_106 = arith.constant 0 : index
    %c0_107 = arith.constant 0 : index
    %162 = vector.load %arg2[%c1_103, %c1_104, %c1_105, %c0_106, %c0_107] : memref<3x3x4x4x1xf32, #tpu.memory_space<vmem>>, vector<1x1x1x4x1xf32>
    %163 = vector.shape_cast %162 : vector<1x1x1x4x1xf32> to vector<4x1xf32>
    %164 = vector.shape_cast %163 : vector<4x1xf32> to vector<1x4x1xf32>
    %165 = vector.extract_strided_slice %153 {offsets = [0, 1, 0], sizes = [2, 1, 256], strides = [1, 1, 1]} : vector<2x4x256xf32> to vector<2x1x256xf32>
    %166 = vector.broadcast %164 : vector<1x4x1xf32> to vector<2x4x256xf32>
    %167 = vector.broadcast %165 : vector<2x1x256xf32> to vector<2x4x256xf32>
    %168 = arith.mulf %166, %167 : vector<2x4x256xf32>
    %169 = arith.addf %161, %168 : vector<2x4x256xf32>
    %c1_108 = arith.constant 1 : index
    %c1_109 = arith.constant 1 : index
    %c2_110 = arith.constant 2 : index
    %c0_111 = arith.constant 0 : index
    %c0_112 = arith.constant 0 : index
    %170 = vector.load %arg2[%c1_108, %c1_109, %c2_110, %c0_111, %c0_112] : memref<3x3x4x4x1xf32, #tpu.memory_space<vmem>>, vector<1x1x1x4x1xf32>
    %171 = vector.shape_cast %170 : vector<1x1x1x4x1xf32> to vector<4x1xf32>
    %172 = vector.shape_cast %171 : vector<4x1xf32> to vector<1x4x1xf32>
    %173 = vector.extract_strided_slice %153 {offsets = [0, 2, 0], sizes = [2, 1, 256], strides = [1, 1, 1]} : vector<2x4x256xf32> to vector<2x1x256xf32>
    %174 = vector.broadcast %172 : vector<1x4x1xf32> to vector<2x4x256xf32>
    %175 = vector.broadcast %173 : vector<2x1x256xf32> to vector<2x4x256xf32>
    %176 = arith.mulf %174, %175 : vector<2x4x256xf32>
    %177 = arith.addf %169, %176 : vector<2x4x256xf32>
    %c1_113 = arith.constant 1 : index
    %c1_114 = arith.constant 1 : index
    %c3_115 = arith.constant 3 : index
    %c0_116 = arith.constant 0 : index
    %c0_117 = arith.constant 0 : index
    %178 = vector.load %arg2[%c1_113, %c1_114, %c3_115, %c0_116, %c0_117] : memref<3x3x4x4x1xf32, #tpu.memory_space<vmem>>, vector<1x1x1x4x1xf32>
    %179 = vector.shape_cast %178 : vector<1x1x1x4x1xf32> to vector<4x1xf32>
    %180 = vector.shape_cast %179 : vector<4x1xf32> to vector<1x4x1xf32>
    %181 = vector.extract_strided_slice %153 {offsets = [0, 3, 0], sizes = [2, 1, 256], strides = [1, 1, 1]} : vector<2x4x256xf32> to vector<2x1x256xf32>
    %182 = vector.broadcast %180 : vector<1x4x1xf32> to vector<2x4x256xf32>
    %183 = vector.broadcast %181 : vector<2x1x256xf32> to vector<2x4x256xf32>
    %184 = arith.mulf %182, %183 : vector<2x4x256xf32>
    %185 = arith.addf %177, %184 : vector<2x4x256xf32>
    %c255_i32 = arith.constant 255 : i32
    %186 = tpu.dynamic_rotate %0 by %c255_i32 dim 2 : vector<2x4x256xf32>, i32 -> vector<2x4x256xf32>
    %c5 = arith.constant 5 : index
    %c0_118 = arith.constant 0 : index
    %c0_119 = arith.constant 0 : index
    %c0_120 = arith.constant 0 : index
    %187 = vector.load %arg4[%c5, %c0_118, %c0_119, %c0_120] : memref<9x1x1x256xf32, #tpu.memory_space<vmem>>, vector<1x1x1x256xf32>
    %188 = vector.shape_cast %187 : vector<1x1x1x256xf32> to vector<1x1x256xf32>
    %189 = vector.broadcast %188 : vector<1x1x256xf32> to vector<2x4x256xf32>
    %190 = arith.mulf %186, %189 : vector<2x4x256xf32>
    %c1_121 = arith.constant 1 : index
    %c2_122 = arith.constant 2 : index
    %c0_123 = arith.constant 0 : index
    %c0_124 = arith.constant 0 : index
    %c0_125 = arith.constant 0 : index
    %191 = vector.load %arg2[%c1_121, %c2_122, %c0_123, %c0_124, %c0_125] : memref<3x3x4x4x1xf32, #tpu.memory_space<vmem>>, vector<1x1x1x4x1xf32>
    %192 = vector.shape_cast %191 : vector<1x1x1x4x1xf32> to vector<4x1xf32>
    %193 = vector.shape_cast %192 : vector<4x1xf32> to vector<1x4x1xf32>
    %194 = vector.extract_strided_slice %190 {offsets = [0, 0, 0], sizes = [2, 1, 256], strides = [1, 1, 1]} : vector<2x4x256xf32> to vector<2x1x256xf32>
    %195 = vector.broadcast %193 : vector<1x4x1xf32> to vector<2x4x256xf32>
    %196 = vector.broadcast %194 : vector<2x1x256xf32> to vector<2x4x256xf32>
    %197 = arith.mulf %195, %196 : vector<2x4x256xf32>
    %198 = arith.addf %185, %197 : vector<2x4x256xf32>
    %c1_126 = arith.constant 1 : index
    %c2_127 = arith.constant 2 : index
    %c1_128 = arith.constant 1 : index
    %c0_129 = arith.constant 0 : index
    %c0_130 = arith.constant 0 : index
    %199 = vector.load %arg2[%c1_126, %c2_127, %c1_128, %c0_129, %c0_130] : memref<3x3x4x4x1xf32, #tpu.memory_space<vmem>>, vector<1x1x1x4x1xf32>
    %200 = vector.shape_cast %199 : vector<1x1x1x4x1xf32> to vector<4x1xf32>
    %201 = vector.shape_cast %200 : vector<4x1xf32> to vector<1x4x1xf32>
    %202 = vector.extract_strided_slice %190 {offsets = [0, 1, 0], sizes = [2, 1, 256], strides = [1, 1, 1]} : vector<2x4x256xf32> to vector<2x1x256xf32>
    %203 = vector.broadcast %201 : vector<1x4x1xf32> to vector<2x4x256xf32>
    %204 = vector.broadcast %202 : vector<2x1x256xf32> to vector<2x4x256xf32>
    %205 = arith.mulf %203, %204 : vector<2x4x256xf32>
    %206 = arith.addf %198, %205 : vector<2x4x256xf32>
    %c1_131 = arith.constant 1 : index
    %c2_132 = arith.constant 2 : index
    %c2_133 = arith.constant 2 : index
    %c0_134 = arith.constant 0 : index
    %c0_135 = arith.constant 0 : index
    %207 = vector.load %arg2[%c1_131, %c2_132, %c2_133, %c0_134, %c0_135] : memref<3x3x4x4x1xf32, #tpu.memory_space<vmem>>, vector<1x1x1x4x1xf32>
    %208 = vector.shape_cast %207 : vector<1x1x1x4x1xf32> to vector<4x1xf32>
    %209 = vector.shape_cast %208 : vector<4x1xf32> to vector<1x4x1xf32>
    %210 = vector.extract_strided_slice %190 {offsets = [0, 2, 0], sizes = [2, 1, 256], strides = [1, 1, 1]} : vector<2x4x256xf32> to vector<2x1x256xf32>
    %211 = vector.broadcast %209 : vector<1x4x1xf32> to vector<2x4x256xf32>
    %212 = vector.broadcast %210 : vector<2x1x256xf32> to vector<2x4x256xf32>
    %213 = arith.mulf %211, %212 : vector<2x4x256xf32>
    %214 = arith.addf %206, %213 : vector<2x4x256xf32>
    %c1_136 = arith.constant 1 : index
    %c2_137 = arith.constant 2 : index
    %c3_138 = arith.constant 3 : index
    %c0_139 = arith.constant 0 : index
    %c0_140 = arith.constant 0 : index
    %215 = vector.load %arg2[%c1_136, %c2_137, %c3_138, %c0_139, %c0_140] : memref<3x3x4x4x1xf32, #tpu.memory_space<vmem>>, vector<1x1x1x4x1xf32>
    %216 = vector.shape_cast %215 : vector<1x1x1x4x1xf32> to vector<4x1xf32>
    %217 = vector.shape_cast %216 : vector<4x1xf32> to vector<1x4x1xf32>
    %218 = vector.extract_strided_slice %190 {offsets = [0, 3, 0], sizes = [2, 1, 256], strides = [1, 1, 1]} : vector<2x4x256xf32> to vector<2x1x256xf32>
    %219 = vector.broadcast %217 : vector<1x4x1xf32> to vector<2x4x256xf32>
    %220 = vector.broadcast %218 : vector<2x1x256xf32> to vector<2x4x256xf32>
    %221 = arith.mulf %219, %220 : vector<2x4x256xf32>
    %222 = arith.addf %214, %221 : vector<2x4x256xf32>
    %c241_i32 = arith.constant 241 : i32
    %223 = tpu.dynamic_rotate %0 by %c241_i32 dim 2 : vector<2x4x256xf32>, i32 -> vector<2x4x256xf32>
    %c6 = arith.constant 6 : index
    %c0_141 = arith.constant 0 : index
    %c0_142 = arith.constant 0 : index
    %c0_143 = arith.constant 0 : index
    %224 = vector.load %arg4[%c6, %c0_141, %c0_142, %c0_143] : memref<9x1x1x256xf32, #tpu.memory_space<vmem>>, vector<1x1x1x256xf32>
    %225 = vector.shape_cast %224 : vector<1x1x1x256xf32> to vector<1x1x256xf32>
    %226 = vector.broadcast %225 : vector<1x1x256xf32> to vector<2x4x256xf32>
    %227 = arith.mulf %223, %226 : vector<2x4x256xf32>
    %c2_144 = arith.constant 2 : index
    %c0_145 = arith.constant 0 : index
    %c0_146 = arith.constant 0 : index
    %c0_147 = arith.constant 0 : index
    %c0_148 = arith.constant 0 : index
    %228 = vector.load %arg2[%c2_144, %c0_145, %c0_146, %c0_147, %c0_148] : memref<3x3x4x4x1xf32, #tpu.memory_space<vmem>>, vector<1x1x1x4x1xf32>
    %229 = vector.shape_cast %228 : vector<1x1x1x4x1xf32> to vector<4x1xf32>
    %230 = vector.shape_cast %229 : vector<4x1xf32> to vector<1x4x1xf32>
    %231 = vector.extract_strided_slice %227 {offsets = [0, 0, 0], sizes = [2, 1, 256], strides = [1, 1, 1]} : vector<2x4x256xf32> to vector<2x1x256xf32>
    %232 = vector.broadcast %230 : vector<1x4x1xf32> to vector<2x4x256xf32>
    %233 = vector.broadcast %231 : vector<2x1x256xf32> to vector<2x4x256xf32>
    %234 = arith.mulf %232, %233 : vector<2x4x256xf32>
    %235 = arith.addf %222, %234 : vector<2x4x256xf32>
    %c2_149 = arith.constant 2 : index
    %c0_150 = arith.constant 0 : index
    %c1_151 = arith.constant 1 : index
    %c0_152 = arith.constant 0 : index
    %c0_153 = arith.constant 0 : index
    %236 = vector.load %arg2[%c2_149, %c0_150, %c1_151, %c0_152, %c0_153] : memref<3x3x4x4x1xf32, #tpu.memory_space<vmem>>, vector<1x1x1x4x1xf32>
    %237 = vector.shape_cast %236 : vector<1x1x1x4x1xf32> to vector<4x1xf32>
    %238 = vector.shape_cast %237 : vector<4x1xf32> to vector<1x4x1xf32>
    %239 = vector.extract_strided_slice %227 {offsets = [0, 1, 0], sizes = [2, 1, 256], strides = [1, 1, 1]} : vector<2x4x256xf32> to vector<2x1x256xf32>
    %240 = vector.broadcast %238 : vector<1x4x1xf32> to vector<2x4x256xf32>
    %241 = vector.broadcast %239 : vector<2x1x256xf32> to vector<2x4x256xf32>
    %242 = arith.mulf %240, %241 : vector<2x4x256xf32>
    %243 = arith.addf %235, %242 : vector<2x4x256xf32>
    %c2_154 = arith.constant 2 : index
    %c0_155 = arith.constant 0 : index
    %c2_156 = arith.constant 2 : index
    %c0_157 = arith.constant 0 : index
    %c0_158 = arith.constant 0 : index
    %244 = vector.load %arg2[%c2_154, %c0_155, %c2_156, %c0_157, %c0_158] : memref<3x3x4x4x1xf32, #tpu.memory_space<vmem>>, vector<1x1x1x4x1xf32>
    %245 = vector.shape_cast %244 : vector<1x1x1x4x1xf32> to vector<4x1xf32>
    %246 = vector.shape_cast %245 : vector<4x1xf32> to vector<1x4x1xf32>
    %247 = vector.extract_strided_slice %227 {offsets = [0, 2, 0], sizes = [2, 1, 256], strides = [1, 1, 1]} : vector<2x4x256xf32> to vector<2x1x256xf32>
    %248 = vector.broadcast %246 : vector<1x4x1xf32> to vector<2x4x256xf32>
    %249 = vector.broadcast %247 : vector<2x1x256xf32> to vector<2x4x256xf32>
    %250 = arith.mulf %248, %249 : vector<2x4x256xf32>
    %251 = arith.addf %243, %250 : vector<2x4x256xf32>
    %c2_159 = arith.constant 2 : index
    %c0_160 = arith.constant 0 : index
    %c3_161 = arith.constant 3 : index
    %c0_162 = arith.constant 0 : index
    %c0_163 = arith.constant 0 : index
    %252 = vector.load %arg2[%c2_159, %c0_160, %c3_161, %c0_162, %c0_163] : memref<3x3x4x4x1xf32, #tpu.memory_space<vmem>>, vector<1x1x1x4x1xf32>
    %253 = vector.shape_cast %252 : vector<1x1x1x4x1xf32> to vector<4x1xf32>
    %254 = vector.shape_cast %253 : vector<4x1xf32> to vector<1x4x1xf32>
    %255 = vector.extract_strided_slice %227 {offsets = [0, 3, 0], sizes = [2, 1, 256], strides = [1, 1, 1]} : vector<2x4x256xf32> to vector<2x1x256xf32>
    %256 = vector.broadcast %254 : vector<1x4x1xf32> to vector<2x4x256xf32>
    %257 = vector.broadcast %255 : vector<2x1x256xf32> to vector<2x4x256xf32>
    %258 = arith.mulf %256, %257 : vector<2x4x256xf32>
    %259 = arith.addf %251, %258 : vector<2x4x256xf32>
    %c240_i32 = arith.constant 240 : i32
    %260 = tpu.dynamic_rotate %0 by %c240_i32 dim 2 : vector<2x4x256xf32>, i32 -> vector<2x4x256xf32>
    %c7 = arith.constant 7 : index
    %c0_164 = arith.constant 0 : index
    %c0_165 = arith.constant 0 : index
    %c0_166 = arith.constant 0 : index
    %261 = vector.load %arg4[%c7, %c0_164, %c0_165, %c0_166] : memref<9x1x1x256xf32, #tpu.memory_space<vmem>>, vector<1x1x1x256xf32>
    %262 = vector.shape_cast %261 : vector<1x1x1x256xf32> to vector<1x1x256xf32>
    %263 = vector.broadcast %262 : vector<1x1x256xf32> to vector<2x4x256xf32>
    %264 = arith.mulf %260, %263 : vector<2x4x256xf32>
    %c2_167 = arith.constant 2 : index
    %c1_168 = arith.constant 1 : index
    %c0_169 = arith.constant 0 : index
    %c0_170 = arith.constant 0 : index
    %c0_171 = arith.constant 0 : index
    %265 = vector.load %arg2[%c2_167, %c1_168, %c0_169, %c0_170, %c0_171] : memref<3x3x4x4x1xf32, #tpu.memory_space<vmem>>, vector<1x1x1x4x1xf32>
    %266 = vector.shape_cast %265 : vector<1x1x1x4x1xf32> to vector<4x1xf32>
    %267 = vector.shape_cast %266 : vector<4x1xf32> to vector<1x4x1xf32>
    %268 = vector.extract_strided_slice %264 {offsets = [0, 0, 0], sizes = [2, 1, 256], strides = [1, 1, 1]} : vector<2x4x256xf32> to vector<2x1x256xf32>
    %269 = vector.broadcast %267 : vector<1x4x1xf32> to vector<2x4x256xf32>
    %270 = vector.broadcast %268 : vector<2x1x256xf32> to vector<2x4x256xf32>
    %271 = arith.mulf %269, %270 : vector<2x4x256xf32>
    %272 = arith.addf %259, %271 : vector<2x4x256xf32>
    %c2_172 = arith.constant 2 : index
    %c1_173 = arith.constant 1 : index
    %c1_174 = arith.constant 1 : index
    %c0_175 = arith.constant 0 : index
    %c0_176 = arith.constant 0 : index
    %273 = vector.load %arg2[%c2_172, %c1_173, %c1_174, %c0_175, %c0_176] : memref<3x3x4x4x1xf32, #tpu.memory_space<vmem>>, vector<1x1x1x4x1xf32>
    %274 = vector.shape_cast %273 : vector<1x1x1x4x1xf32> to vector<4x1xf32>
    %275 = vector.shape_cast %274 : vector<4x1xf32> to vector<1x4x1xf32>
    %276 = vector.extract_strided_slice %264 {offsets = [0, 1, 0], sizes = [2, 1, 256], strides = [1, 1, 1]} : vector<2x4x256xf32> to vector<2x1x256xf32>
    %277 = vector.broadcast %275 : vector<1x4x1xf32> to vector<2x4x256xf32>
    %278 = vector.broadcast %276 : vector<2x1x256xf32> to vector<2x4x256xf32>
    %279 = arith.mulf %277, %278 : vector<2x4x256xf32>
    %280 = arith.addf %272, %279 : vector<2x4x256xf32>
    %c2_177 = arith.constant 2 : index
    %c1_178 = arith.constant 1 : index
    %c2_179 = arith.constant 2 : index
    %c0_180 = arith.constant 0 : index
    %c0_181 = arith.constant 0 : index
    %281 = vector.load %arg2[%c2_177, %c1_178, %c2_179, %c0_180, %c0_181] : memref<3x3x4x4x1xf32, #tpu.memory_space<vmem>>, vector<1x1x1x4x1xf32>
    %282 = vector.shape_cast %281 : vector<1x1x1x4x1xf32> to vector<4x1xf32>
    %283 = vector.shape_cast %282 : vector<4x1xf32> to vector<1x4x1xf32>
    %284 = vector.extract_strided_slice %264 {offsets = [0, 2, 0], sizes = [2, 1, 256], strides = [1, 1, 1]} : vector<2x4x256xf32> to vector<2x1x256xf32>
    %285 = vector.broadcast %283 : vector<1x4x1xf32> to vector<2x4x256xf32>
    %286 = vector.broadcast %284 : vector<2x1x256xf32> to vector<2x4x256xf32>
    %287 = arith.mulf %285, %286 : vector<2x4x256xf32>
    %288 = arith.addf %280, %287 : vector<2x4x256xf32>
    %c2_182 = arith.constant 2 : index
    %c1_183 = arith.constant 1 : index
    %c3_184 = arith.constant 3 : index
    %c0_185 = arith.constant 0 : index
    %c0_186 = arith.constant 0 : index
    %289 = vector.load %arg2[%c2_182, %c1_183, %c3_184, %c0_185, %c0_186] : memref<3x3x4x4x1xf32, #tpu.memory_space<vmem>>, vector<1x1x1x4x1xf32>
    %290 = vector.shape_cast %289 : vector<1x1x1x4x1xf32> to vector<4x1xf32>
    %291 = vector.shape_cast %290 : vector<4x1xf32> to vector<1x4x1xf32>
    %292 = vector.extract_strided_slice %264 {offsets = [0, 3, 0], sizes = [2, 1, 256], strides = [1, 1, 1]} : vector<2x4x256xf32> to vector<2x1x256xf32>
    %293 = vector.broadcast %291 : vector<1x4x1xf32> to vector<2x4x256xf32>
    %294 = vector.broadcast %292 : vector<2x1x256xf32> to vector<2x4x256xf32>
    %295 = arith.mulf %293, %294 : vector<2x4x256xf32>
    %296 = arith.addf %288, %295 : vector<2x4x256xf32>
    %c239_i32 = arith.constant 239 : i32
    %297 = tpu.dynamic_rotate %0 by %c239_i32 dim 2 : vector<2x4x256xf32>, i32 -> vector<2x4x256xf32>
    %c8 = arith.constant 8 : index
    %c0_187 = arith.constant 0 : index
    %c0_188 = arith.constant 0 : index
    %c0_189 = arith.constant 0 : index
    %298 = vector.load %arg4[%c8, %c0_187, %c0_188, %c0_189] : memref<9x1x1x256xf32, #tpu.memory_space<vmem>>, vector<1x1x1x256xf32>
    %299 = vector.shape_cast %298 : vector<1x1x1x256xf32> to vector<1x1x256xf32>
    %300 = vector.broadcast %299 : vector<1x1x256xf32> to vector<2x4x256xf32>
    %301 = arith.mulf %297, %300 : vector<2x4x256xf32>
    %c2_190 = arith.constant 2 : index
    %c2_191 = arith.constant 2 : index
    %c0_192 = arith.constant 0 : index
    %c0_193 = arith.constant 0 : index
    %c0_194 = arith.constant 0 : index
    %302 = vector.load %arg2[%c2_190, %c2_191, %c0_192, %c0_193, %c0_194] : memref<3x3x4x4x1xf32, #tpu.memory_space<vmem>>, vector<1x1x1x4x1xf32>
    %303 = vector.shape_cast %302 : vector<1x1x1x4x1xf32> to vector<4x1xf32>
    %304 = vector.shape_cast %303 : vector<4x1xf32> to vector<1x4x1xf32>
    %305 = vector.extract_strided_slice %301 {offsets = [0, 0, 0], sizes = [2, 1, 256], strides = [1, 1, 1]} : vector<2x4x256xf32> to vector<2x1x256xf32>
    %306 = vector.broadcast %304 : vector<1x4x1xf32> to vector<2x4x256xf32>
    %307 = vector.broadcast %305 : vector<2x1x256xf32> to vector<2x4x256xf32>
    %308 = arith.mulf %306, %307 : vector<2x4x256xf32>
    %309 = arith.addf %296, %308 : vector<2x4x256xf32>
    %c2_195 = arith.constant 2 : index
    %c2_196 = arith.constant 2 : index
    %c1_197 = arith.constant 1 : index
    %c0_198 = arith.constant 0 : index
    %c0_199 = arith.constant 0 : index
    %310 = vector.load %arg2[%c2_195, %c2_196, %c1_197, %c0_198, %c0_199] : memref<3x3x4x4x1xf32, #tpu.memory_space<vmem>>, vector<1x1x1x4x1xf32>
    %311 = vector.shape_cast %310 : vector<1x1x1x4x1xf32> to vector<4x1xf32>
    %312 = vector.shape_cast %311 : vector<4x1xf32> to vector<1x4x1xf32>
    %313 = vector.extract_strided_slice %301 {offsets = [0, 1, 0], sizes = [2, 1, 256], strides = [1, 1, 1]} : vector<2x4x256xf32> to vector<2x1x256xf32>
    %314 = vector.broadcast %312 : vector<1x4x1xf32> to vector<2x4x256xf32>
    %315 = vector.broadcast %313 : vector<2x1x256xf32> to vector<2x4x256xf32>
    %316 = arith.mulf %314, %315 : vector<2x4x256xf32>
    %317 = arith.addf %309, %316 : vector<2x4x256xf32>
    %c2_200 = arith.constant 2 : index
    %c2_201 = arith.constant 2 : index
    %c2_202 = arith.constant 2 : index
    %c0_203 = arith.constant 0 : index
    %c0_204 = arith.constant 0 : index
    %318 = vector.load %arg2[%c2_200, %c2_201, %c2_202, %c0_203, %c0_204] : memref<3x3x4x4x1xf32, #tpu.memory_space<vmem>>, vector<1x1x1x4x1xf32>
    %319 = vector.shape_cast %318 : vector<1x1x1x4x1xf32> to vector<4x1xf32>
    %320 = vector.shape_cast %319 : vector<4x1xf32> to vector<1x4x1xf32>
    %321 = vector.extract_strided_slice %301 {offsets = [0, 2, 0], sizes = [2, 1, 256], strides = [1, 1, 1]} : vector<2x4x256xf32> to vector<2x1x256xf32>
    %322 = vector.broadcast %320 : vector<1x4x1xf32> to vector<2x4x256xf32>
    %323 = vector.broadcast %321 : vector<2x1x256xf32> to vector<2x4x256xf32>
    %324 = arith.mulf %322, %323 : vector<2x4x256xf32>
    %325 = arith.addf %317, %324 : vector<2x4x256xf32>
    %c2_205 = arith.constant 2 : index
    %c2_206 = arith.constant 2 : index
    %c3_207 = arith.constant 3 : index
    %c0_208 = arith.constant 0 : index
    %c0_209 = arith.constant 0 : index
    %326 = vector.load %arg2[%c2_205, %c2_206, %c3_207, %c0_208, %c0_209] : memref<3x3x4x4x1xf32, #tpu.memory_space<vmem>>, vector<1x1x1x4x1xf32>
    %327 = vector.shape_cast %326 : vector<1x1x1x4x1xf32> to vector<4x1xf32>
    %328 = vector.shape_cast %327 : vector<4x1xf32> to vector<1x4x1xf32>
    %329 = vector.extract_strided_slice %301 {offsets = [0, 3, 0], sizes = [2, 1, 256], strides = [1, 1, 1]} : vector<2x4x256xf32> to vector<2x1x256xf32>
    %330 = vector.broadcast %328 : vector<1x4x1xf32> to vector<2x4x256xf32>
    %331 = vector.broadcast %329 : vector<2x1x256xf32> to vector<2x4x256xf32>
    %332 = arith.mulf %330, %331 : vector<2x4x256xf32>
    %333 = arith.addf %325, %332 : vector<2x4x256xf32>
    %334 = arith.addf %0, %333 : vector<2x4x256xf32>
    %c0_210 = arith.constant 0 : index
    %c0_211 = arith.constant 0 : index
    %335 = vector.load %arg3[%c0_210, %c0_211] : memref<4x1xf32, #tpu.memory_space<vmem>>, vector<4x1xf32>
    %336 = vector.shape_cast %335 : vector<4x1xf32> to vector<1x4x1xf32>
    %337 = vector.broadcast %336 : vector<1x4x1xf32> to vector<2x4x256xf32>
    %338 = arith.addf %334, %337 : vector<2x4x256xf32>
    %c0_212 = arith.constant 0 : index
    %c0_213 = arith.constant 0 : index
    %c0_214 = arith.constant 0 : index
    %339 = vector.load %arg5[%c0_212, %c0_213, %c0_214] : memref<2x4x256xf32, #tpu.memory_space<vmem>>, vector<2x4x256xf32>
    tpu.vector_store %arg5[%c0_212, %c0_213, %c0_214], %338 {strides = array<i32>} : memref<2x4x256xf32, #tpu.memory_space<vmem>>, vector<2x4x256xf32>,
    return
  }
  func.func @transform_0(%arg0: i32) -> (i32, i32, i32) {
    %c0_i32 = arith.constant 0 : i32
    %c0_i32_0 = arith.constant 0 : i32
    %c0_i32_1 = arith.constant 0 : i32
    return %arg0, %c0_i32, %c0_i32_0 : i32, i32, i32
  }
  func.func @transform_1(%arg0: i32) -> (i32, i32, i32, i32, i32) {
    %c0_i32 = arith.constant 0 : i32
    %c0_i32_0 = arith.constant 0 : i32
    %c0_i32_1 = arith.constant 0 : i32
    %c0_i32_2 = arith.constant 0 : i32
    %c0_i32_3 = arith.constant 0 : i32
    %c0_i32_4 = arith.constant 0 : i32
    return %c0_i32, %c0_i32_0, %c0_i32_1, %c0_i32_2, %c0_i32_3 : i32, i32, i32, i32, i32
  }
  func.func @transform_2(%arg0: i32) -> (i32, i32) {
    %c0_i32 = arith.constant 0 : i32
    %c0_i32_0 = arith.constant 0 : i32
    %c0_i32_1 = arith.constant 0 : i32
    return %c0_i32, %c0_i32_0 : i32, i32
  }
  func.func @transform_3(%arg0: i32) -> (i32, i32, i32, i32) {
    %c0_i32 = arith.constant 0 : i32
    %c0_i32_0 = arith.constant 0 : i32
    %c0_i32_1 = arith.constant 0 : i32
    %c0_i32_2 = arith.constant 0 : i32
    %c0_i32_3 = arith.constant 0 : i32
    return %c0_i32, %c0_i32_0, %c0_i32_1, %c0_i32_2 : i32, i32, i32, i32
  }
  func.func @transform_4(%arg0: i32) -> (i32, i32, i32) {
    %c0_i32 = arith.constant 0 : i32
    %c0_i32_0 = arith.constant 0 : i32
    %c0_i32_1 = arith.constant 0 : i32
    return %arg0, %c0_i32, %c0_i32_0 : i32, i32, i32
  }
}

</mosaic_0001>

<bundles_post_ra>
// kernel: tpu_custom_call.1
= control target key start
LH: loop header
LB: loop body
LE: loop exit
PB: predicated region body
PF: predicated region fallthrough
CT: control target
= control target key end

     0   :  { %s1608_s19 = smov 17   ;;  %v1609_v3 = vmov 0   ;;  %s2406_s0 = inlined_call_operand.vmem [shape: f32[2,4,256], index: 0, kind: input, shape index: {}]   ;;  %s2407_s1 = inlined_call_operand.vmem [shape: f32[3,3,4,4,1], index: 1, kind: input, shape index: {}]   ;;  %s2408_s2 = inlined_call_operand.vmem [shape: f32[4,1], index: 2, kind: input, shape index: {}]   ;;  %s2409_s3 = inlined_call_operand.vmem [shape: f32[9,1,1,256], index: 3, kind: input, shape index: {}]   ;;  %s2410_s4 = inlined_call_operand.hbm [shape: f32[2,4,256], index: 4, kind: output, shape index: {}]  }
   0x1   :  { %v1649_v0 = vld [vmem:[%s2406_s0] sm:$0xff]  ;;  %v1654_v1 = vld [vmem:[%s2406_s0 + $0x8] sm:$0xff]  ;;  %1579 = vset.pattern.permute.xlu1 %v1609_v3  ;;  %1578 = vset.pattern.permute.xlu0 %v1609_v3 }
   0x2   :  { %26 = vrot.lane.b32.xlu0 %v1649_v0, %s1608_s19  ;;  %v1659_v2 = vcombine.high %v1649_v0, %v1649_v0  ;;  %v1664_v4 = vcombine.high %v1654_v1, %v1654_v1  ;;  %v57_v5 = vld [vmem:[%s2407_s1] sm:$0xf]  ;;  %v1522_v6 = vld [vmem:[%s2407_s1 + $0x4] sm:$0xf]  ;;  %v1524_v7 = vld [vmem:[%s2407_s1 + $0xc] sm:$0xf] }
   0x3   :  { %v1523_v8 = vld [vmem:[%s2407_s1 + $0x8] sm:$0xf] }
   0x4   :  { %30 = vrot.lane.b32.xlu1 %v1659_v2, %s1608_s19 }
   0x6   :  { %28 = vrot.lane.b32.xlu0 %v1654_v1, %s1608_s19 }
   0x8   :  { %32 = vrot.lane.b32.xlu1 %v1664_v4, %s1608_s19 }
   0xa   :  { %60 = vperm.xlu0 %1578, %v57_v5  }
   0xc   :  { %91 = vperm.xlu1 %1579, %v1522_v6  }
   0xe   :  { %153 = vperm.xlu0 %1578, %v1524_v7  }
  0x10   :  { %122 = vperm.xlu1 %1579, %v1523_v8  }
  0x11   :  { %9 = vsyncpa [#allocation3], 0  ;;  %s1610_s28 = smov 16   ;;  %v1527_v9 = vld [vmem:[%s2407_s1 + $0x14] sm:$0xf]  ;;  %s1611_s11 = smov 15   ;;  %v34_v37 = vlaneseq }
  0x12   :  { %182 = vrot.lane.b32.xlu0 %v1654_v1, %s1610_s28  ;;  %v1526_v10 = vld [vmem:[%s2407_s1 + $0x10] sm:$0xf]  ;;  %v1529_v11 = vld [vmem:[%s2407_s1 + $0x1c] sm:$0xf]  ;;  %v1528_v12 = vld [vmem:[%s2407_s1 + $0x18] sm:$0xf] }
  0x13   :  { %v1532_v13 = vld [vmem:[%s2407_s1 + $0x24] sm:$0xf]  ;;  %v1531_v14 = vld [vmem:[%s2407_s1 + $0x20] sm:$0xf]  ;;  %v1534_v15 = vld [vmem:[%s2407_s1 + $0x2c] sm:$0xf] }
  0x14   :  { %180 = vrot.lane.b32.xlu1 %v1649_v0, %s1610_s28  ;;  %v1533_v16 = vld [vmem:[%s2407_s1 + $0x28] sm:$0xf]  ;;  %s1612_s20 = smov 1   ;;  %v1537_v17 = vld [vmem:[%s2407_s1 + $0x34] sm:$0xf]  ;;  %s1613_s13 = smov 127  }
  0x15   :  { %v1536_v18 = vld [vmem:[%s2407_s1 + $0x30] sm:$0xf]  ;;  %v1539_v19 = vld [vmem:[%s2407_s1 + $0x3c] sm:$0xf]  ;;  %v1538_v20 = vld [vmem:[%s2407_s1 + $0x38] sm:$0xf] }
  0x16   :  { %186 = vrot.lane.b32.xlu0 %v1664_v4, %s1610_s28  ;;  %v1542_v21 = vld [vmem:[%s2407_s1 + $0x44] sm:$0xf]  ;;  %v1541_v22 = vld [vmem:[%s2407_s1 + $0x40] sm:$0xf]  ;;  %v1544_v23 = vld [vmem:[%s2407_s1 + $0x4c] sm:$0xf] }
  0x17   :  { %v1543_v24 = vld [vmem:[%s2407_s1 + $0x48] sm:$0xf]  ;;  %v1546_v25 = vld [vmem:[%s2407_s1 + $0x50] sm:$0xf]  ;;  %v1547_v26 = vld [vmem:[%s2407_s1 + $0x54] sm:$0xf] }
  0x18   :  { %184 = vrot.lane.b32.xlu1 %v1659_v2, %s1610_s28  ;;  %v1549_v27 = vld [vmem:[%s2407_s1 + $0x5c] sm:$0xf]  ;;  %v1548_v28 = vld [vmem:[%s2407_s1 + $0x58] sm:$0xf]  ;;  %v1551_v29 = vld [vmem:[%s2407_s1 + $0x60] sm:$0xf] }
  0x19   :  { %s1614_s22 = smov 113   ;;  %v1552_v30 = vld [vmem:[%s2407_s1 + $0x64] sm:$0xf]  ;;  %v1554_v31 = vld [vmem:[%s2407_s1 + $0x6c] sm:$0xf]  ;;  %s1615_s5 = smov 112  }
  0x1a   :  { %245 = vperm.xlu0 %1578, %v1527_v9   ;;  %v1553_v32 = vld [vmem:[%s2407_s1 + $0x68] sm:$0xf]  ;;  %v1556_v33 = vld [vmem:[%s2407_s1 + $0x70] sm:$0xf]  ;;  %v1557_v34 = vld [vmem:[%s2407_s1 + $0x74] sm:$0xf] }
  0x1b   :  { %v1559_v35 = vld [vmem:[%s2407_s1 + $0x7c] sm:$0xf]  ;;  %v1558_v36 = vld [vmem:[%s2407_s1 + $0x78] sm:$0xf]  ;;  %v1561_v38 = vld [vmem:[%s2407_s1 + $0x80] sm:$0xf] }
  0x1c   :  { %214 = vperm.xlu1 %1579, %v1526_v10   ;;  %s1616_s14 = smov 111   ;;  %v1792_v39 = vshrl.u32 %v34_v37, 7  ;;  %v1562_v42 = vld [vmem:[%s2407_s1 + $0x84] sm:$0xf]  ;;  %v1540_v43 = vld [vmem:[%s2409_s3 + $0x8] sm:$0x3] }
  0x1d   :  { %v1808_v46 = vand.u32 127, %v34_v37  ;;  %v1564_v49 = vld [vmem:[%s2407_s1 + $0x8c] sm:$0xf]  ;;  %v41_v50 = vld [vmem:[%s2409_s3] sm:$0x3] }
  0x1e   :  { %307 = vperm.xlu0 %1578, %v1529_v11   ;;  %v1802_v44 = vsub.s32 0, %v1792_v39  ;;  %v1805_v45 = vsub.s32 1, %v1792_v39  ;;  %v1563_v53 = vld [vmem:[%s2407_s1 + $0x88] sm:$0xf]  ;;  %v1489_v62 = vld [vmem:[%s2408_s2] sm:$0xf] }
  0x1f   :  { %vm36_vm0 = vcmp.lt.s32.totalorder %v1808_v46, 17  ;;  %v1525_v63 = vld [vmem:[%s2409_s3 + $0x2] sm:$0x3]  ;;  %v1530_v3 = vld [vmem:[%s2409_s3 + $0x4] sm:$0x3]  ;;  %v723_v6 = vsub.s32 5, %v1792_v39 }
  0x20   :  { %276 = vperm.xlu1 %1579, %v1528_v12   ;;  %v648_v47 = vrot.slane %v1540_v43, %v1802_v44  ;;  %v652_v48 = vrot.slane %v1540_v43, %v1805_v45  ;;  %v46_v55 = vrot.slane %v41_v50, %v1802_v44  ;;  %v50_v56 = vrot.slane %v41_v50, %v1805_v45 }
  0x21   :  { %vm188_vm1 = vcmp.lt.s32.totalorder %v1808_v46, 16  ;;  %vm342_vm2 = vcmp.lt.s32.totalorder %v1808_v46, 15  ;;  %vm496_vm3 = vcmp.lt.s32.totalorder %v1808_v46, 1  ;;  %vm871_vm4 = vcmp.lt.s32.totalorder %v1808_v46, 127 }
  0x22   :  { %336 = vrot.lane.b32.xlu0 %v1654_v1, %s1611_s11  ;;  %v653_v54 = vcombine.low %v648_v47, %v652_v48  ;;  %vm1025_vm5 = vcmp.lt.s32.totalorder %v1808_v46, 113  ;;  %vm1179_vm6 = vcmp.lt.s32.totalorder %v1808_v46, 112  ;;  %vm1333_vm7 = vcmp.lt.s32.totalorder %v1808_v46, 111 }
  0x24   :  { %334 = vrot.lane.b32.xlu1 %v1649_v0, %s1611_s11  ;;  %v1841_v5 = vmul.f32 %v653_v54, %v1654_v1  ;;  %v1845_v7 = vmul.f32 %v653_v54, %v1649_v0 }
  0x26   :  { %340 = vrot.lane.b32.xlu0 %v1664_v4, %s1611_s11 }
  0x28   :  { %338 = vrot.lane.b32.xlu1 %v1659_v2, %s1611_s11 }
  0x2a   :  { %399 = vperm.xlu0 %1578, %v1532_v13   ;;  %v1856_v13 = vsub.s32 3, %v1792_v39 }
  0x2c   :  { %368 = vperm.xlu1 %1579, %v1531_v14  }
  0x2e   :  { %461 = vperm.xlu0 %1578, %v1534_v15   ;;  %v1864_v15 = vrot.slane %v1530_v3, %v1802_v44 }
  0x30   :  { %430 = vperm.xlu1 %1579, %v1533_v16   ;;  %v1867_v16 = vrot.slane %v1530_v3, %v1805_v45 }
  0x32   :  { %490 = vrot.lane.b32.xlu0 %v1654_v1, %s1612_s20 }
  0x34   :  { %488 = vrot.lane.b32.xlu1 %v1649_v0, %s1612_s20 }
  0x36   :  { %494 = vrot.lane.b32.xlu0 %v1664_v4, %s1612_s20 }
  0x38   :  { %492 = vrot.lane.b32.xlu1 %v1659_v2, %s1612_s20 }
  0x3a   :  { %553 = vperm.xlu0 %1578, %v1537_v17  }
  0x3c   :  { %522 = vperm.xlu1 %1579, %v1536_v18  }
  0x3e   :  { %615 = vperm.xlu0 %1578, %v1539_v19   ;;  %v728_v19 = vrot.slane %v1841_v5, %v1805_v45 }
  0x40   :  { %584 = vperm.xlu1 %1579, %v1538_v20   ;;  %v1878_v20 = vrot.slane %v1841_v5, %v723_v6 }
  0x42   :  { %714 = vperm.xlu0 %1578, %v1542_v21   ;;  %v720_v21 = vrot.slane %v1845_v7, %v1805_v45 }
  0x44   :  { %661 = vperm.xlu1 %1579, %v1541_v22   ;;  %v1883_v22 = vrot.slane %v1845_v7, %v723_v6 }
  0x46   :  { %816 = vperm.xlu0 %1578, %v1544_v23  }
  0x48   :  { %765 = vperm.xlu1 %1579, %v1543_v24  }
  0x4a   :  { %863 = vrot.lane.b32.xlu0 %v1649_v0, %s1613_s13 }
  0x4c   :  { %897 = vperm.xlu1 %1579, %v1546_v25  }
  0x4e   :  { %867 = vrot.lane.b32.xlu0 %v1659_v2, %s1613_s13 }
  0x50   :  { %865 = vrot.lane.b32.xlu1 %v1654_v1, %s1613_s13 }
  0x52   :  { %928 = vperm.xlu0 %1578, %v1547_v26  }
  0x54   :  { %869 = vrot.lane.b32.xlu1 %v1664_v4, %s1613_s13 }
  0x56   :  { %990 = vperm.xlu0 %1578, %v1549_v27  }
  0x58   :  { %959 = vperm.xlu1 %1579, %v1548_v28  }
  0x5a   :  { %1017 = vrot.lane.b32.xlu0 %v1649_v0, %s1614_s22 }
  0x5c   :  { %1051 = vperm.xlu1 %1579, %v1551_v29  }
  0x5e   :  { %1021 = vrot.lane.b32.xlu0 %v1659_v2, %s1614_s22 }
  0x60   :  { %1019 = vrot.lane.b32.xlu1 %v1654_v1, %s1614_s22 }
  0x62   :  { %1082 = vperm.xlu0 %1578, %v1552_v30  }
  0x64   :  { %1023 = vrot.lane.b32.xlu1 %v1664_v4, %s1614_s22 }
  0x66   :  { %1144 = vperm.xlu0 %1578, %v1554_v31  }
  0x68   :  { %1113 = vperm.xlu1 %1579, %v1553_v32  }
  0x6a   :  { %1171 = vrot.lane.b32.xlu0 %v1649_v0, %s1615_s5 }
  0x6c   :  { %1205 = vperm.xlu1 %1579, %v1556_v33  }
  0x6e   :  { %1175 = vrot.lane.b32.xlu0 %v1659_v2, %s1615_s5 }
  0x70   :  { %1173 = vrot.lane.b32.xlu1 %v1654_v1, %s1615_s5 }
  0x72   :  { %1236 = vperm.xlu0 %1578, %v1557_v34  }
  0x74   :  { %1177 = vrot.lane.b32.xlu1 %v1664_v4, %s1615_s5  ;;  %v27_v40 = vpop.permute.xlu0 %26 }
  0x76   :  { %1298 = vperm.xlu0 %1578, %v1559_v35   ;;  %v31_v41 = vpop.permute.xlu1 %30 }
  0x77   :  { %v37_v57 = vsel %vm36_vm0, %v27_v40, %v31_v41  ;;  %v39_v58 = vsel %vm36_vm0, %v31_v41, %v27_v40 }
  0x78   :  { %1267 = vperm.xlu1 %1579, %v1558_v36   ;;  %v29_v51 = vpop.permute.xlu0 %28  ;;  %v1847_v8 = vmul.f32 %v46_v55, %v39_v58  ;;  %v1849_v9 = vmul.f32 %v50_v56, %v37_v57 }
  0x7a   :  { %1325 = vrot.lane.b32.xlu0 %v1649_v0, %s1616_s14  ;;  %v33_v52 = vpop.permute.xlu1 %32  ;;  %v203_v0 = vrot.slane %v1525_v63, %v1805_v45  ;;  %v66_v23 = vrot.slane %v1847_v8, %v1802_v44  ;;  %v70_v24 = vrot.slane %v1849_v9, %v1802_v44  ;;  %v97_v30 = vrot.slane %v1847_v8, %v1805_v45 }
  0x7b   :  { %v38_v59 = vsel %vm36_vm0, %v29_v51, %v33_v52  ;;  %v40_v60 = vsel %vm36_vm0, %v33_v52, %v29_v51  ;;  %v101_v31 = vrot.slane %v1849_v9, %v1805_v45  ;;  %v159_v37 = vrot.slane %v1847_v8, %v1856_v13 }
  0x7c   :  { %1359 = vperm.xlu1 %1579, %v1561_v38   ;;  %v1851_v10 = vmul.f32 %v46_v55, %v40_v60  ;;  %v1853_v11 = vmul.f32 %v50_v56, %v38_v59  ;;  %v163_v38 = vrot.slane %v1849_v9, %v1856_v13 }
  0x7e   :  { %1329 = vrot.lane.b32.xlu0 %v1659_v2, %s1616_s14  ;;  %v1832_v2 = vsub.s32 2, %v1792_v39  ;;  %v105_v25 = vrot.slane %v1851_v10, %v1805_v45  ;;  %v109_v26 = vrot.slane %v1853_v11, %v1805_v45  ;;  %v74_v28 = vrot.slane %v1851_v10, %v1802_v44 }
  0x7f   :  { %v78_v29 = vrot.slane %v1853_v11, %v1802_v44  ;;  %v167_v52 = vrot.slane %v1851_v10, %v1856_v13 }
  0x80   :  { %1327 = vrot.lane.b32.xlu1 %v1654_v1, %s1616_s14  ;;  %v199_v1 = vrot.slane %v1525_v63, %v1802_v44  ;;  %v136_v34 = vrot.slane %v1851_v10, %v1832_v2  ;;  %v140_v35 = vrot.slane %v1853_v11, %v1832_v2  ;;  %v128_v40 = vrot.slane %v1847_v8, %v1832_v2 }
  0x81   :  { %v132_v41 = vrot.slane %v1849_v9, %v1832_v2 }
  0x82   :  { %1390 = vperm.xlu0 %1578, %v1562_v42  }
  0x84   :  { %1331 = vrot.lane.b32.xlu1 %v1664_v4, %s1616_s14  ;;  %v1535_v4 = vld [vmem:[%s2409_s3 + $0x6] sm:$0x3]  ;;  %s1618_s14 = smov [#allocation2]  }
  0x85   :  { %v1870_v17 = vrot.slane %v1535_v4, %v1802_v44  ;;  %v1873_v18 = vrot.slane %v1535_v4, %v1805_v45  ;;  %s1511_s15 = sshll.u32 %s1618_s14, 4  ;;  %s1512_s15 = int_to_ptr.vmem [resolvable:$true] %s1511_s15 }
  0x86   :  { %1452 = vperm.xlu0 %1578, %v1564_v49   ;;  %s1584_s18 = scalar_lea.vmem %s1512_s15, 256  ;;  %p1589_p1 = scmp.lt.s32.totalorder %s1512_s15, %s1512_s15 }
  0x87   :  { %p1585_p0 = scmp.ne.s32.totalorder %s1512_s15, %s1584_s18  ;;  %p1590_p2 = scmp.lt.s32.totalorder %s1584_s18, %s1584_s18 }
  0x88   :  { %1421 = vperm.xlu1 %1579, %v1563_v53   ;;  %v171_v53 = vrot.slane %v1853_v11, %v1856_v13 }
  0x89   :  { %v61_v61 = vpop.permute.xlu0 %60  ;;  %p1591_p3 = por %p1590_p2, %p1589_p1 }
  0x8a   :  { %v81_v42 = vmul.f32 %v74_v28, %v61_v61  ;;  %v82_v43 = vmul.f32 %v78_v29, %v61_v61  ;;  %v79_v54 = vmul.f32 %v66_v23, %v61_v61  ;;  %v80_v55 = vmul.f32 %v70_v24, %v61_v61 }
  0x8b   :  { %v92_v12 = vpop.permute.xlu1 %91  ;;  %p1592_p4 = pnand %p1591_p3, %p1585_p0 }
  0x8c   :  { %1492 = vperm.xlu1 %1579, %v1489_v62   ;;  %v112_v32 = vmul.f32 %v105_v25, %v92_v12  ;;  %v113_v33 = vmul.f32 %v109_v26, %v92_v12  ;;  %v110_v50 = vmul.f32 %v97_v30, %v92_v12  ;;  %v111_v51 = vmul.f32 %v101_v31, %v92_v12 }
  0x8d   :  { %v1861_v14 = vpop.permute.xlu0 %153 }
  0x8e   :  { %v116_v56 = vadd.f32 %v112_v32, %v81_v42  ;;  %v117_v57 = vadd.f32 %v113_v33, %v82_v43  ;;  %v114_v10 = vadd.f32 %v110_v50, %v79_v54  ;;  %v115_v61 = vadd.f32 %v111_v51, %v80_v55 }
  0x8f   :  { %v123_v27 = vpop.permute.xlu1 %122  ;;  %v174_v23 = vmul.f32 %v167_v52, %v1861_v14  ;;  %v175_v24 = vmul.f32 %v171_v53, %v1861_v14  ;;  %v172_v42 = vmul.f32 %v159_v37, %v1861_v14  ;;  %v173_v43 = vmul.f32 %v163_v38, %v1861_v14 }
  0x90   :  { %v143_v47 = vmul.f32 %v136_v34, %v123_v27  ;;  %v144_v48 = vmul.f32 %v140_v35, %v123_v27  ;;  %v141_v59 = vmul.f32 %v128_v40, %v123_v27  ;;  %v142_v60 = vmul.f32 %v132_v41, %v123_v27 }
  0x91   :  { %v183_v36 = vpop.permute.xlu0 %182  ;;  %v669_v37 = vrot.slane %v1845_v7, %v1802_v44  ;;  %v672_v14 = vsub.s32 4, %v1792_v39 }
  0x92   :  { %v147_v3 = vadd.f32 %v143_v47, %v116_v56  ;;  %v148_v4 = vadd.f32 %v144_v48, %v117_v57  ;;  %v145_v28 = vadd.f32 %v141_v59, %v114_v10  ;;  %v146_v29 = vadd.f32 %v142_v60, %v115_v61 }
  0x93   :  { %v181_v49 = vpop.permute.xlu1 %180  ;;  %v677_v59 = vrot.slane %v1841_v5, %v1802_v44 }
  0x94   :  { %v178_v34 = vadd.f32 %v174_v23, %v147_v3  ;;  %v176_v54 = vadd.f32 %v172_v42, %v145_v28  ;;  %v177_v55 = vadd.f32 %v173_v43, %v146_v29 }
  0x95   :  { %v187_v58 = vpop.permute.xlu0 %186 }
  0x96   :  { %v190_v62 = vsel %vm188_vm1, %v183_v36, %v187_v58  ;;  %v192_v63 = vsel %vm188_vm1, %v187_v58, %v183_v36  ;;  %v1963_v58 = vrot.slane %v728_v19, %v1805_v45 }
  0x97   :  { %v1921_v6 = vmul.f32 %v199_v1, %v192_v63  ;;  %v1923_v8 = vmul.f32 %v203_v0, %v190_v62  ;;  %v185_v9 = vpop.permute.xlu1 %184 }
  0x98   :  { %v189_v11 = vsel %vm188_vm1, %v181_v49, %v185_v9  ;;  %v191_v12 = vsel %vm188_vm1, %v185_v9, %v181_v49 }
  0x99   :  { %v1931_v25 = vmul.f32 %v199_v1, %v191_v12  ;;  %v1933_v26 = vmul.f32 %v203_v0, %v189_v11  ;;  %v246_v27 = vpop.permute.xlu0 %245  ;;  %v228_v30 = vrot.slane %v1921_v6, %v1802_v44  ;;  %v232_v31 = vrot.slane %v1923_v8, %v1802_v44 }
  0x9a   :  { %v259_v32 = vrot.slane %v1921_v6, %v1805_v45  ;;  %v263_v33 = vrot.slane %v1923_v8, %v1805_v45  ;;  %v179_v1 = vadd.f32 %v175_v24, %v148_v4  ;;  %v290_v63 = vrot.slane %v1921_v6, %v1832_v2 }
  0x9b   :  { %v215_v35 = vpop.permute.xlu1 %214  ;;  %v220_v0 = vrot.slane %v1931_v25, %v1802_v44  ;;  %v224_v36 = vrot.slane %v1933_v26, %v1802_v44  ;;  %v251_v47 = vrot.slane %v1931_v25, %v1805_v45  ;;  %v255_v48 = vrot.slane %v1933_v26, %v1805_v45 }
  0x9c   :  { %v235_v40 = vmul.f32 %v228_v30, %v215_v35  ;;  %v236_v41 = vmul.f32 %v232_v31, %v215_v35  ;;  %v266_v38 = vmul.f32 %v259_v32, %v246_v27  ;;  %v267_v57 = vmul.f32 %v263_v33, %v246_v27 }
  0x9d   :  { %v1954_v49 = vpop.permute.xlu0 %307  ;;  %v233_v50 = vmul.f32 %v220_v0, %v215_v35  ;;  %v234_v51 = vmul.f32 %v224_v36, %v215_v35  ;;  %v294_v3 = vrot.slane %v1923_v8, %v1832_v2  ;;  %v264_v9 = vmul.f32 %v251_v47, %v246_v27 }
  0x9e   :  { %v239_v52 = vadd.f32 %v235_v40, %v178_v34  ;;  %v240_v53 = vadd.f32 %v236_v41, %v179_v1  ;;  %v265_v10 = vmul.f32 %v255_v48, %v246_v27  ;;  %v282_v19 = vrot.slane %v1931_v25, %v1832_v2 }
  0x9f   :  { %v277_v56 = vpop.permute.xlu1 %276  ;;  %v237_v60 = vadd.f32 %v233_v50, %v176_v54  ;;  %v238_v62 = vadd.f32 %v234_v51, %v177_v55  ;;  %v286_v12 = vrot.slane %v1933_v26, %v1832_v2  ;;  %v321_v29 = vrot.slane %v1921_v6, %v1856_v13 }
  0xa0   :  { %v270_v61 = vadd.f32 %v266_v38, %v239_v52  ;;  %v271_v11 = vadd.f32 %v267_v57, %v240_v53  ;;  %v297_v23 = vmul.f32 %v290_v63, %v277_v56  ;;  %v298_v24 = vmul.f32 %v294_v3, %v277_v56 }
  0xa1   :  { %v337_v4 = vpop.permute.xlu0 %336  ;;  %v325_v30 = vrot.slane %v1923_v8, %v1856_v13  ;;  %v752_v27 = vrot.slane %v1878_v20, %v1805_v45  ;;  %v1985_v31 = vrot.slane %v720_v21, %v1805_v45  ;;  %v268_v32 = vadd.f32 %v264_v9, %v237_v60 }
  0xa2   :  { %v269_v33 = vadd.f32 %v265_v10, %v238_v62  ;;  %v295_v34 = vmul.f32 %v282_v19, %v277_v56  ;;  %v296_v1 = vmul.f32 %v286_v12, %v277_v56  ;;  %v301_v0 = vadd.f32 %v297_v23, %v270_v61 }
  0xa3   :  { %v335_v28 = vpop.permute.xlu1 %334  ;;  %v302_v36 = vadd.f32 %v298_v24, %v271_v11  ;;  %v313_v40 = vrot.slane %v1931_v25, %v1856_v13  ;;  %v317_v21 = vrot.slane %v1933_v26, %v1856_v13  ;;  %v328_v47 = vmul.f32 %v321_v29, %v1954_v49 }
  0xa4   :  { %v329_v48 = vmul.f32 %v325_v30, %v1954_v49  ;;  %v299_v51 = vadd.f32 %v295_v34, %v268_v32  ;;  %v300_v52 = vadd.f32 %v296_v1, %v269_v33  ;;  %v744_v12 = vrot.slane %v1883_v22, %v1805_v45 }
  0xa5   :  { %v341_v35 = vpop.permute.xlu0 %340  ;;  %v332_v55 = vadd.f32 %v328_v47, %v301_v0  ;;  %v326_v61 = vmul.f32 %v313_v40, %v1954_v49  ;;  %v327_v11 = vmul.f32 %v317_v21, %v1954_v49  ;;  %v2037_v23 = vrot.slane %v1845_v7, %v672_v14 }
  0xa6   :  { %v344_v6 = vsel %vm342_vm2, %v337_v4, %v341_v35  ;;  %v346_v8 = vsel %vm342_vm2, %v341_v35, %v337_v4  ;;  %v333_v56 = vadd.f32 %v329_v48, %v302_v36  ;;  %v2042_v49 = vrot.slane %v1841_v5, %v672_v14 }
  0xa7   :  { %v1996_v41 = vmul.f32 %v1864_v15, %v346_v8  ;;  %v1999_v42 = vmul.f32 %v1867_v16, %v344_v6  ;;  %v339_v43 = vpop.permute.xlu1 %338  ;;  %v330_v32 = vadd.f32 %v326_v61, %v299_v51  ;;  %v331_v33 = vadd.f32 %v327_v11, %v300_v52 }
  0xa8   :  { %v343_v50 = vsel %vm342_vm2, %v335_v28, %v339_v43  ;;  %v345_v25 = vsel %vm342_vm2, %v339_v43, %v335_v28  ;;  %v2048_v1 = vrot.slane %v669_v37, %v1802_v44 }
  0xa9   :  { %v2008_v26 = vmul.f32 %v1864_v15, %v345_v25  ;;  %v2011_v53 = vmul.f32 %v1867_v16, %v343_v50  ;;  %v400_v54 = vpop.permute.xlu0 %399  ;;  %v382_v38 = vrot.slane %v1996_v41, %v1802_v44  ;;  %v386_v57 = vrot.slane %v1999_v42, %v1802_v44 }
  0xaa   :  { %v413_v60 = vrot.slane %v1996_v41, %v1805_v45  ;;  %v417_v62 = vrot.slane %v1999_v42, %v1805_v45  ;;  %v444_v21 = vrot.slane %v1996_v41, %v1832_v2  ;;  %v448_v43 = vrot.slane %v1999_v42, %v1832_v2 }
  0xab   :  { %v405_v15 = vrot.slane %v2008_v26, %v1805_v45  ;;  %v409_v16 = vrot.slane %v2011_v53, %v1805_v45  ;;  %v369_v63 = vpop.permute.xlu1 %368  ;;  %v374_v3 = vrot.slane %v2008_v26, %v1802_v44  ;;  %v378_v4 = vrot.slane %v2011_v53, %v1802_v44 }
  0xac   :  { %v389_v9 = vmul.f32 %v382_v38, %v369_v63  ;;  %v390_v10 = vmul.f32 %v386_v57, %v369_v63  ;;  %v420_v36 = vmul.f32 %v413_v60, %v400_v54  ;;  %v421_v6 = vmul.f32 %v417_v62, %v400_v54 }
  0xad   :  { %v462_v19 = vpop.permute.xlu0 %461  ;;  %v387_v24 = vmul.f32 %v374_v3, %v369_v63  ;;  %v388_v28 = vmul.f32 %v378_v4, %v369_v63  ;;  %v418_v35 = vmul.f32 %v405_v15, %v400_v54  ;;  %v419_v0 = vmul.f32 %v409_v16, %v400_v54 }
  0xae   :  { %v393_v29 = vadd.f32 %v389_v9, %v332_v55  ;;  %v394_v30 = vadd.f32 %v390_v10, %v333_v56  ;;  %v467_v47 = vrot.slane %v2008_v26, %v1856_v13  ;;  %v471_v37 = vrot.slane %v2011_v53, %v1856_v13 }
  0xaf   :  { %v431_v34 = vpop.permute.xlu1 %430  ;;  %v391_v8 = vadd.f32 %v387_v24, %v330_v32  ;;  %v392_v40 = vadd.f32 %v388_v28, %v331_v33  ;;  %v436_v25 = vrot.slane %v2008_v26, %v1832_v2  ;;  %v440_v51 = vrot.slane %v2011_v53, %v1832_v2 }
  0xb0   :  { %v424_v48 = vadd.f32 %v420_v36, %v393_v29  ;;  %v425_v50 = vadd.f32 %v421_v6, %v394_v30  ;;  %v451_v52 = vmul.f32 %v444_v21, %v431_v34  ;;  %v452_v54 = vmul.f32 %v448_v43, %v431_v34 }
  0xb1   :  { %v491_v14 = vpop.permute.xlu0 %490  ;;  %v475_v56 = vrot.slane %v1996_v41, %v1856_v13  ;;  %v479_v38 = vrot.slane %v1999_v42, %v1856_v13  ;;  %v2070_v57 = vrot.slane %v677_v59, %v1802_v44  ;;  %v825_v26 = vsub.s32 7, %v1792_v39 }
  0xb2   :  { %v422_v60 = vadd.f32 %v418_v35, %v391_v8  ;;  %v423_v62 = vadd.f32 %v419_v0, %v392_v40  ;;  %v449_v53 = vmul.f32 %v436_v25, %v431_v34  ;;  %v450_v15 = vmul.f32 %v440_v51, %v431_v34 }
  0xb3   :  { %v489_v55 = vpop.permute.xlu1 %488  ;;  %v455_v63 = vadd.f32 %v451_v52, %v424_v48  ;;  %v456_v3 = vadd.f32 %v452_v54, %v425_v50  ;;  %v480_v4 = vmul.f32 %v467_v47, %v462_v19  ;;  %v481_v9 = vmul.f32 %v471_v37, %v462_v19 }
  0xb4   :  { %v482_v11 = vmul.f32 %v475_v56, %v462_v19  ;;  %v483_v24 = vmul.f32 %v479_v38, %v462_v19  ;;  %v453_v30 = vadd.f32 %v449_v53, %v422_v60  ;;  %v454_v32 = vadd.f32 %v450_v15, %v423_v62 }
  0xb5   :  { %v495_v16 = vpop.permute.xlu0 %494  ;;  %v693_v51 = vrot.slane %v2037_v23, %v1802_v44  ;;  %v774_v52 = vsub.s32 6, %v1792_v39 }
  0xb6   :  { %v498_v41 = vsel %vm496_vm3, %v491_v14, %v495_v16  ;;  %v500_v42 = vsel %vm496_vm3, %v495_v16, %v491_v14  ;;  %v486_v0 = vadd.f32 %v482_v11, %v455_v63  ;;  %v487_v36 = vadd.f32 %v483_v24, %v456_v3 }
  0xb7   :  { %v2078_v59 = vmul.f32 %v1870_v17, %v500_v42  ;;  %v2081_v10 = vmul.f32 %v1873_v18, %v498_v41  ;;  %v493_v61 = vpop.permute.xlu1 %492  ;;  %v484_v48 = vadd.f32 %v480_v4, %v453_v30  ;;  %v485_v50 = vadd.f32 %v481_v9, %v454_v32 }
  0xb8   :  { %v497_v28 = vsel %vm496_vm3, %v489_v55, %v493_v61  ;;  %v499_v29 = vsel %vm496_vm3, %v493_v61, %v489_v55 }
  0xb9   :  { %v514_v33 = vmul.f32 %v1870_v17, %v499_v29  ;;  %v515_v34 = vmul.f32 %v1873_v18, %v497_v28  ;;  %v554_v35 = vpop.permute.xlu0 %553  ;;  %v536_v6 = vrot.slane %v2078_v59, %v1802_v44  ;;  %v540_v19 = vrot.slane %v2081_v10, %v1802_v44 }
  0xba   :  { %v567_v8 = vrot.slane %v2078_v59, %v1805_v45  ;;  %v571_v40 = vrot.slane %v2081_v10, %v1805_v45  ;;  %v598_v9 = vrot.slane %v2078_v59, %v1832_v2  ;;  %v602_v61 = vrot.slane %v2081_v10, %v1832_v2 }
  0xbb   :  { %v559_v21 = vrot.slane %v514_v33, %v1805_v45  ;;  %v563_v17 = vrot.slane %v515_v34, %v1805_v45  ;;  %v523_v18 = vpop.permute.xlu1 %522  ;;  %v528_v43 = vrot.slane %v514_v33, %v1802_v44  ;;  %v532_v14 = vrot.slane %v515_v34, %v1802_v44 }
  0xbc   :  { %v543_v47 = vmul.f32 %v536_v6, %v523_v18  ;;  %v544_v37 = vmul.f32 %v540_v19, %v523_v18  ;;  %v574_v53 = vmul.f32 %v567_v8, %v554_v35  ;;  %v575_v15 = vmul.f32 %v571_v40, %v554_v35 }
  0xbd   :  { %v616_v25 = vpop.permute.xlu0 %615  ;;  %v541_v54 = vmul.f32 %v528_v43, %v523_v18  ;;  %v542_v55 = vmul.f32 %v532_v14, %v523_v18  ;;  %v572_v60 = vmul.f32 %v559_v21, %v554_v35  ;;  %v573_v62 = vmul.f32 %v563_v17, %v554_v35 }
  0xbe   :  { %v547_v56 = vadd.f32 %v543_v47, %v486_v0  ;;  %v548_v38 = vadd.f32 %v544_v37, %v487_v36  ;;  %v621_v41 = vrot.slane %v514_v33, %v1856_v13  ;;  %v625_v42 = vrot.slane %v515_v34, %v1856_v13 }
  0xbf   :  { %v585_v16 = vpop.permute.xlu1 %584  ;;  %v545_v63 = vadd.f32 %v541_v54, %v484_v48  ;;  %v546_v3 = vadd.f32 %v542_v55, %v485_v50  ;;  %v590_v4 = vrot.slane %v514_v33, %v1832_v2  ;;  %v594_v23 = vrot.slane %v515_v34, %v1832_v2 }
  0xc0   :  { %v578_v29 = vadd.f32 %v574_v53, %v547_v56  ;;  %v579_v30 = vadd.f32 %v575_v15, %v548_v38  ;;  %v605_v0 = vmul.f32 %v598_v9, %v585_v16  ;;  %v606_v36 = vmul.f32 %v602_v61, %v585_v16  ;;  %v1545_v15 = vld [vmem:[%s2409_s3 + $0xa] sm:$0x3] }
  0xc1   :  { %v2112_v11 = vpop.permute.xlu0 %714  ;;  %v576_v24 = vadd.f32 %v572_v60, %v545_v63  ;;  %v577_v28 = vadd.f32 %v573_v62, %v546_v3  ;;  %v603_v32 = vmul.f32 %v590_v4, %v585_v16  ;;  %v604_v35 = vmul.f32 %v594_v23, %v585_v16 }
  0xc2   :  { %v701_v33 = vrot.slane %v2042_v49, %v1802_v44  ;;  %v830_v34 = vrot.slane %v1841_v5, %v1856_v13  ;;  %v771_v19 = vrot.slane %v1845_v7, %v1832_v2  ;;  %v775_v8 = vrot.slane %v1845_v7, %v774_v52 }
  0xc3   :  { %v662_v6 = vpop.permute.xlu1 %661  ;;  %v634_v40 = vmul.f32 %v621_v41, %v616_v25  ;;  %v635_v21 = vmul.f32 %v625_v42, %v616_v25  ;;  %v607_v17 = vadd.f32 %v603_v32, %v576_v24  ;;  %v608_v18 = vadd.f32 %v604_v35, %v577_v28 }
  0xc4   :  { %v629_v14 = vrot.slane %v2078_v59, %v1856_v13  ;;  %v633_v49 = vrot.slane %v2081_v10, %v1856_v13  ;;  %v609_v47 = vadd.f32 %v605_v0, %v578_v29  ;;  %v610_v37 = vadd.f32 %v606_v36, %v579_v30 }
  0xc5   :  { %v2121_v43 = vpop.permute.xlu0 %816  ;;  %v638_v48 = vadd.f32 %v634_v40, %v607_v17  ;;  %v639_v50 = vadd.f32 %v635_v21, %v608_v18  ;;  %v702_v54 = vmul.f32 %v2048_v1, %v662_v6  ;;  %v703_v55 = vmul.f32 %v693_v51, %v662_v6 }
  0xc6   :  { %v636_v38 = vmul.f32 %v629_v14, %v616_v25  ;;  %v637_v60 = vmul.f32 %v633_v49, %v616_v25  ;;  %v822_v62 = vrot.slane %v1845_v7, %v1856_v13  ;;  %v779_v53 = vrot.slane %v1841_v5, %v1832_v2 }
  0xc7   :  { %v766_v56 = vpop.permute.xlu1 %765  ;;  %v2135_v59 = vrot.slane %v1841_v5, %v825_v26  ;;  %v826_v10 = vrot.slane %v1845_v7, %v825_v26  ;;  %v783_v1 = vrot.slane %v1841_v5, %v774_v52  ;;  %v791_v51 = vrot.slane %v771_v19, %v1832_v2 }
  0xc8   :  { %v640_v16 = vadd.f32 %v636_v38, %v609_v47  ;;  %v641_v63 = vadd.f32 %v637_v60, %v610_v37  ;;  %v704_v3 = vmul.f32 %v2070_v57, %v662_v6  ;;  %v705_v41 = vmul.f32 %v701_v33, %v662_v6 }
  0xc9   :  { %v864_v25 = vpop.permute.xlu0 %863  ;;  %v706_v42 = vadd.f32 %v702_v54, %v638_v48  ;;  %v707_v4 = vadd.f32 %v703_v55, %v639_v50  ;;  %v795_v23 = vrot.slane %v775_v8, %v1832_v2  ;;  %v842_v7 = vrot.slane %v822_v62, %v1856_v13 }
  0xca   :  { %v799_v26 = vrot.slane %v779_v53, %v1832_v2  ;;  %v882_v52 = vrot.slane %v1545_v15, %v1802_v44  ;;  %v886_v61 = vrot.slane %v1545_v15, %v1805_v45  ;;  %v753_v24 = vmul.f32 %v1985_v31, %v2112_v11 }
  0xcb   :  { %v898_v9 = vpop.permute.xlu1 %897  ;;  %v754_v57 = vmul.f32 %v744_v12, %v2112_v11  ;;  %v846_v28 = vrot.slane %v826_v10, %v1856_v13  ;;  %v803_v29 = vrot.slane %v783_v1, %v1832_v2  ;;  %v708_v32 = vadd.f32 %v704_v3, %v640_v16 }
  0xcc   :  { %v709_v35 = vadd.f32 %v705_v41, %v641_v63  ;;  %v757_v6 = vadd.f32 %v753_v24, %v706_v42  ;;  %v804_v33 = vmul.f32 %v791_v51, %v766_v56  ;;  %v805_v19 = vmul.f32 %v795_v23, %v766_v56 }
  0xcd   :  { %v868_v30 = vpop.permute.xlu0 %867  ;;  %v758_v31 = vadd.f32 %v754_v57, %v707_v4  ;;  %v755_v22 = vmul.f32 %v1963_v58, %v2112_v11  ;;  %v756_v12 = vmul.f32 %v752_v27, %v2112_v11  ;;  %v806_v17 = vmul.f32 %v799_v26, %v766_v56  ;;  %v1550_v26 = vld [vmem:[%s2409_s3 + $0xc] sm:$0x3] }
  0xce   :  { %v872_v0 = vsel %vm871_vm4, %v864_v25, %v868_v30  ;;  %v874_v36 = vsel %vm871_vm4, %v868_v30, %v864_v25  ;;  %v807_v18 = vmul.f32 %v803_v29, %v766_v56  ;;  %v808_v48 = vadd.f32 %v804_v33, %v757_v6 }
  0xcf   :  { %v866_v8 = vpop.permute.xlu1 %865  ;;  %v2170_v40 = vmul.f32 %v882_v52, %v872_v0  ;;  %v2172_v21 = vmul.f32 %v886_v61, %v874_v36  ;;  %v759_v49 = vadd.f32 %v755_v22, %v708_v32  ;;  %v760_v47 = vadd.f32 %v756_v12, %v709_v35  ;;  %v1555_v22 = vld [vmem:[%s2409_s3 + $0xe] sm:$0x3] }
  0xd0   :  { %v809_v50 = vadd.f32 %v805_v19, %v758_v31  ;;  %v850_v20 = vrot.slane %v830_v34, %v1856_v13  ;;  %v854_v27 = vrot.slane %v2135_v59, %v1856_v13  ;;  %v855_v11 = vmul.f32 %v842_v7, %v2121_v43 }
  0xd1   :  { %v929_v14 = vpop.permute.xlu0 %928  ;;  %v903_v37 = vrot.slane %v2170_v40, %v1802_v44  ;;  %v907_v58 = vrot.slane %v2172_v21, %v1802_v44  ;;  %v856_v55 = vmul.f32 %v846_v28, %v2121_v43  ;;  %v810_v10 = vadd.f32 %v806_v17, %v759_v49 }
  0xd2   :  { %v811_v5 = vadd.f32 %v807_v18, %v760_v47  ;;  %v859_v59 = vadd.f32 %v855_v11, %v808_v48  ;;  %v934_v25 = vrot.slane %v2170_v40, %v1805_v45  ;;  %v938_v15 = vrot.slane %v2172_v21, %v1805_v45 }
  0xd3   :  { %v870_v54 = vpop.permute.xlu1 %869  ;;  %v916_v56 = vmul.f32 %v903_v37, %v898_v9  ;;  %v917_v38 = vmul.f32 %v907_v58, %v898_v9  ;;  %v860_v51 = vadd.f32 %v856_v55, %v809_v50  ;;  %v857_v41 = vmul.f32 %v850_v20, %v2121_v43 }
  0xd4   :  { %v873_v60 = vsel %vm871_vm4, %v866_v8, %v870_v54  ;;  %v875_v62 = vsel %vm871_vm4, %v870_v54, %v866_v8  ;;  %v858_v42 = vmul.f32 %v854_v27, %v2121_v43  ;;  %v947_v30 = vmul.f32 %v934_v25, %v929_v14 }
  0xd5   :  { %v2190_v53 = vpop.permute.xlu0 %990  ;;  %v2192_v34 = vmul.f32 %v882_v52, %v873_v60  ;;  %v2194_v1 = vmul.f32 %v886_v61, %v875_v62  ;;  %v920_v4 = vadd.f32 %v916_v56, %v859_v59  ;;  %v921_v23 = vadd.f32 %v917_v38, %v860_v51 }
  0xd6   :  { %v861_v28 = vadd.f32 %v857_v41, %v810_v10  ;;  %v862_v29 = vadd.f32 %v858_v42, %v811_v5  ;;  %v948_v32 = vmul.f32 %v938_v15, %v929_v14  ;;  %v965_v35 = vrot.slane %v2170_v40, %v1832_v2 }
  0xd7   :  { %v960_v16 = vpop.permute.xlu1 %959  ;;  %v911_v63 = vrot.slane %v2192_v34, %v1802_v44  ;;  %v915_v3 = vrot.slane %v2194_v1, %v1802_v44  ;;  %v942_v24 = vrot.slane %v2192_v34, %v1805_v45  ;;  %v946_v57 = vrot.slane %v2194_v1, %v1805_v45 }
  0xd8   :  { %v969_v0 = vrot.slane %v2172_v21, %v1832_v2  ;;  %v1040_v36 = vrot.slane %v1550_v26, %v1805_v45  ;;  %v951_v6 = vadd.f32 %v947_v30, %v920_v4  ;;  %v952_v31 = vadd.f32 %v948_v32, %v921_v23 }
  0xd9   :  { %v1018_v7 = vpop.permute.xlu0 %1017  ;;  %v918_v52 = vmul.f32 %v911_v63, %v898_v9  ;;  %v919_v61 = vmul.f32 %v915_v3, %v898_v9  ;;  %v1036_v9 = vrot.slane %v1550_v26, %v1802_v44  ;;  %v949_v12 = vmul.f32 %v942_v24, %v929_v14 }
  0xda   :  { %v950_v17 = vmul.f32 %v946_v57, %v929_v14  ;;  %v973_v18 = vrot.slane %v2192_v34, %v1832_v2  ;;  %v977_v49 = vrot.slane %v2194_v1, %v1832_v2  ;;  %v978_v47 = vmul.f32 %v965_v35, %v960_v16 }
  0xdb   :  { %v2214_v43 = vpop.permute.xlu1 %1051  ;;  %v922_v33 = vadd.f32 %v918_v52, %v861_v28  ;;  %v923_v19 = vadd.f32 %v919_v61, %v862_v29  ;;  %v979_v37 = vmul.f32 %v969_v0, %v960_v16  ;;  %v996_v54 = vrot.slane %v2170_v40, %v1856_v13 }
  0xdc   :  { %v1000_v14 = vrot.slane %v2172_v21, %v1856_v13  ;;  %v2238_v20 = vrot.slane %v1555_v22, %v1802_v44  ;;  %v1004_v60 = vrot.slane %v2192_v34, %v1856_v13  ;;  %v1008_v62 = vrot.slane %v2194_v1, %v1856_v13 }
  0xdd   :  { %v1022_v8 = vpop.permute.xlu0 %1021  ;;  %v953_v27 = vadd.f32 %v949_v12, %v922_v33  ;;  %v954_v11 = vadd.f32 %v950_v17, %v923_v19  ;;  %v980_v40 = vmul.f32 %v973_v18, %v960_v16  ;;  %v981_v10 = vmul.f32 %v977_v49, %v960_v16 }
  0xde   :  { %v1026_v58 = vsel %vm1025_vm5, %v1018_v7, %v1022_v8  ;;  %v1028_v48 = vsel %vm1025_vm5, %v1022_v8, %v1018_v7  ;;  %v982_v5 = vadd.f32 %v978_v47, %v951_v6  ;;  %v983_v21 = vadd.f32 %v979_v37, %v952_v31 }
  0xdf   :  { %v1020_v50 = vpop.permute.xlu1 %1019  ;;  %v2240_v55 = vmul.f32 %v1036_v9, %v1026_v58  ;;  %v2242_v56 = vmul.f32 %v1040_v36, %v1028_v48  ;;  %v1009_v15 = vmul.f32 %v996_v54, %v2190_v53  ;;  %v1010_v63 = vmul.f32 %v1000_v14, %v2190_v53 }
  0xe0   :  { %v984_v16 = vadd.f32 %v980_v40, %v953_v27  ;;  %v985_v3 = vadd.f32 %v981_v10, %v954_v11  ;;  %v1011_v23 = vmul.f32 %v1004_v60, %v2190_v53  ;;  %v1012_v7 = vmul.f32 %v1008_v62, %v2190_v53 }
  0xe1   :  { %v1083_v38 = vpop.permute.xlu0 %1082  ;;  %v1057_v59 = vrot.slane %v2240_v55, %v1802_v44  ;;  %v1061_v51 = vrot.slane %v2242_v56, %v1802_v44  ;;  %v1013_v61 = vadd.f32 %v1009_v15, %v982_v5  ;;  %v1014_v24 = vadd.f32 %v1010_v63, %v983_v21 }
  0xe2   :  { %v1088_v57 = vrot.slane %v2240_v55, %v1805_v45  ;;  %v1092_v28 = vrot.slane %v2242_v56, %v1805_v45  ;;  %v2278_v53 = vrot.slane %v1555_v22, %v1805_v45  ;;  %v1015_v35 = vadd.f32 %v1011_v23, %v984_v16 }
  0xe3   :  { %v1024_v25 = vpop.permute.xlu1 %1023  ;;  %v1070_v41 = vmul.f32 %v1057_v59, %v2214_v43  ;;  %v1071_v42 = vmul.f32 %v1061_v51, %v2214_v43  ;;  %v1016_v0 = vadd.f32 %v1012_v7, %v985_v3  ;;  %v1119_v22 = vrot.slane %v2240_v55, %v1832_v2 }
  0xe4   :  { %v1027_v34 = vsel %vm1025_vm5, %v1020_v50, %v1024_v25  ;;  %v1029_v1 = vsel %vm1025_vm5, %v1024_v25, %v1020_v50  ;;  %v1101_v12 = vmul.f32 %v1088_v57, %v1083_v38  ;;  %v1102_v17 = vmul.f32 %v1092_v28, %v1083_v38 }
  0xe5   :  { %v2261_v4 = vpop.permute.xlu0 %1144  ;;  %v2265_v26 = vmul.f32 %v1036_v9, %v1027_v34  ;;  %v2267_v52 = vmul.f32 %v1040_v36, %v1029_v1  ;;  %v1074_v9 = vadd.f32 %v1070_v41, %v1013_v61  ;;  %v1075_v36 = vadd.f32 %v1071_v42, %v1014_v24 }
  0xe6   :  { %v1123_v18 = vrot.slane %v2242_v56, %v1832_v2  ;;  %v1150_v47 = vrot.slane %v2240_v55, %v1856_v13  ;;  %v1617_v5 = vmov 839922192  }
  0xe7   :  { %v1114_v29 = vpop.permute.xlu1 %1113  ;;  %v1065_v30 = vrot.slane %v2265_v26, %v1802_v44  ;;  %v1069_v32 = vrot.slane %v2267_v52, %v1802_v44  ;;  %v1096_v19 = vrot.slane %v2265_v26, %v1805_v45  ;;  %v1100_v8 = vrot.slane %v2267_v52, %v1805_v45 }
  0xe8   :  { %v1105_v48 = vadd.f32 %v1101_v12, %v1074_v9  ;;  %v1106_v50 = vadd.f32 %v1102_v17, %v1075_v36  ;;  %v1132_v54 = vmul.f32 %v1119_v22, %v1114_v29  ;;  %v1133_v14 = vmul.f32 %v1123_v18, %v1114_v29 }
  0xe9   :  { %v1172_v6 = vpop.permute.xlu0 %1171  ;;  %v1072_v31 = vmul.f32 %v1065_v30, %v2214_v43  ;;  %v1073_v33 = vmul.f32 %v1069_v32, %v2214_v43  ;;  %v1154_v43 = vrot.slane %v2242_v56, %v1856_v13  ;;  %v1103_v11 = vmul.f32 %v1096_v19, %v1083_v38 }
  0xea   :  { %v1104_v60 = vmul.f32 %v1100_v8, %v1083_v38  ;;  %v1127_v62 = vrot.slane %v2265_v26, %v1832_v2  ;;  %v1131_v40 = vrot.slane %v2267_v52, %v1832_v2  ;;  %v2304_v21 = vunpack.c.l.s4 %v1617_v5 }
  0xeb   :  { %v2290_v49 = vpop.permute.xlu1 %1205  ;;  %v1076_v37 = vadd.f32 %v1072_v31, %v1015_v35  ;;  %v1077_v58 = vadd.f32 %v1073_v33, %v1016_v0  ;;  %v1163_v59 = vmul.f32 %v1150_v47, %v2261_v4  ;;  %v1164_v38 = vmul.f32 %v1154_v43, %v2261_v4 }
  0xec   :  { %v1136_v15 = vadd.f32 %v1132_v54, %v1105_v48  ;;  %v1137_v63 = vadd.f32 %v1133_v14, %v1106_v50  ;;  %v1158_v3 = vrot.slane %v2265_v26, %v1856_v13  ;;  %v1162_v41 = vrot.slane %v2267_v52, %v1856_v13 }
  0xed   :  { %v1176_v27 = vpop.permute.xlu0 %1175  ;;  %v1107_v51 = vadd.f32 %v1103_v11, %v1076_v37  ;;  %v1108_v25 = vadd.f32 %v1104_v60, %v1077_v58  ;;  %v1134_v42 = vmul.f32 %v1127_v62, %v1114_v29  ;;  %v1135_v23 = vmul.f32 %v1131_v40, %v1114_v29  ;;  %v1560_v60 = vld [vmem:[%s2409_s3 + $0x10] sm:$0x3] }
  0xee   :  { %v1180_v55 = vsel %vm1179_vm6, %v1172_v6, %v1176_v27  ;;  %v1182_v56 = vsel %vm1179_vm6, %v1176_v27, %v1172_v6  ;;  %v1167_v32 = vadd.f32 %v1163_v59, %v1136_v15  ;;  %v1168_v35 = vadd.f32 %v1164_v38, %v1137_v63 }
  0xef   :  { %v1174_v10 = vpop.permute.xlu1 %1173  ;;  %v2309_v34 = vmul.f32 %v2238_v20, %v1180_v55  ;;  %v2312_v1 = vmul.f32 %v2278_v53, %v1182_v56  ;;  %v1138_v30 = vadd.f32 %v1134_v42, %v1107_v51  ;;  %v1139_v26 = vadd.f32 %v1135_v23, %v1108_v25 }
  0xf0   :  { %v1165_v6 = vmul.f32 %v1158_v3, %v2261_v4  ;;  %v1166_v31 = vmul.f32 %v1162_v41, %v2261_v4  ;;  %v1344_v25 = vrot.slane %v1560_v60, %v1802_v44  ;;  %v1348_v15 = vrot.slane %v1560_v60, %v1805_v45 }
  0xf1   :  { %v1237_v16 = vpop.permute.xlu0 %1236  ;;  %v1211_v7 = vrot.slane %v2309_v34, %v1802_v44  ;;  %v1215_v61 = vrot.slane %v2312_v1, %v1802_v44  ;;  %v1242_v24 = vrot.slane %v2309_v34, %v1805_v45  ;;  %v1246_v57 = vrot.slane %v2312_v1, %v1805_v45 }
  0xf2   :  { %v1169_v48 = vadd.f32 %v1165_v6, %v1138_v30  ;;  %v1170_v50 = vadd.f32 %v1166_v31, %v1139_v26  ;;  %v1277_v4 = vrot.slane %v2312_v1, %v1832_v2  ;;  %v1496_v63 = vunpack.c.0.s8 %v2304_v21 }
  0xf3   :  { %v1178_v28 = vpop.permute.xlu1 %1177  ;;  %v1224_v0 = vmul.f32 %v1211_v7, %v2290_v49  ;;  %v1225_v9 = vmul.f32 %v1215_v61, %v2290_v49  ;;  %v1255_v17 = vmul.f32 %v1242_v24, %v1237_v16  ;;  %v1256_v22 = vmul.f32 %v1246_v57, %v1237_v16 }
  0xf4   :  { %v1181_v52 = vsel %vm1179_vm6, %v1174_v10, %v1178_v28  ;;  %v1183_v29 = vsel %vm1179_vm6, %v1178_v28, %v1174_v10  ;;  %v1304_v28 = vrot.slane %v2309_v34, %v1856_v13  ;;  %v1308_v30 = vrot.slane %v2312_v1, %v1856_v13 }
  0xf5   :  { %v1299_v36 = vpop.permute.xlu0 %1298  ;;  %v1199_v33 = vmul.f32 %v2238_v20, %v1181_v52  ;;  %v1200_v19 = vmul.f32 %v2278_v53, %v1183_v29  ;;  %v1228_v8 = vadd.f32 %v1224_v0, %v1167_v32  ;;  %v1229_v12 = vadd.f32 %v1225_v9, %v1168_v35 }
  0xf6   :  { %v1273_v20 = vrot.slane %v2309_v34, %v1832_v2  ;;  %v1317_v9 = vmul.f32 %v1304_v28, %v1299_v36  ;;  %v1318_v6 = vmul.f32 %v1308_v30, %v1299_v36 }
  0xf7   :  { %v1268_v18 = vpop.permute.xlu1 %1267  ;;  %v1219_v47 = vrot.slane %v1199_v33, %v1802_v44  ;;  %v1223_v43 = vrot.slane %v1200_v19, %v1802_v44  ;;  %v1250_v37 = vrot.slane %v1199_v33, %v1805_v45  ;;  %v1254_v58 = vrot.slane %v1200_v19, %v1805_v45 }
  0xf8   :  { %v1259_v54 = vadd.f32 %v1255_v17, %v1228_v8  ;;  %v1260_v14 = vadd.f32 %v1256_v22, %v1229_v12  ;;  %v1281_v55 = vrot.slane %v1199_v33, %v1832_v2  ;;  %v1285_v56 = vrot.slane %v1200_v19, %v1832_v2 }
  0xf9   :  { %v1326_v53 = vpop.permute.xlu0 %1325  ;;  %v1226_v27 = vmul.f32 %v1219_v47, %v2290_v49  ;;  %v1227_v11 = vmul.f32 %v1223_v43, %v2290_v49  ;;  %v1257_v62 = vmul.f32 %v1250_v37, %v1237_v16  ;;  %v1258_v40 = vmul.f32 %v1254_v58, %v1237_v16 }
  0xfa   :  { %v1286_v38 = vmul.f32 %v1273_v20, %v1268_v18  ;;  %v1287_v51 = vmul.f32 %v1277_v4, %v1268_v18  ;;  %v1312_v3 = vrot.slane %v1199_v33, %v1856_v13  ;;  %v1316_v16 = vrot.slane %v1200_v19, %v1856_v13 }
  0xfb   :  { %v1360_v10 = vpop.permute.xlu1 %1359  ;;  %v1230_v5 = vadd.f32 %v1226_v27, %v1169_v48  ;;  %v1231_v59 = vadd.f32 %v1227_v11, %v1170_v50  ;;  %v1288_v23 = vmul.f32 %v1281_v55, %v1268_v18  ;;  %v1289_v7 = vmul.f32 %v1285_v56, %v1268_v18 }
  0xfc   :  { %v1290_v26 = vadd.f32 %v1286_v38, %v1259_v54  ;;  %v1291_v52 = vadd.f32 %v1287_v51, %v1260_v14  ;;  %v1319_v31 = vmul.f32 %v1312_v3, %v1299_v36  ;;  %v1320_v33 = vmul.f32 %v1316_v16, %v1299_v36 }
  0xfd   :  { %v1330_v49 = vpop.permute.xlu0 %1329  ;;  %v1261_v41 = vadd.f32 %v1257_v62, %v1230_v5  ;;  %v1262_v42 = vadd.f32 %v1258_v40, %v1231_v59 }
  0xfe   :  { %v1334_v61 = vsel %vm1333_vm7, %v1326_v53, %v1330_v49  ;;  %v1336_v24 = vsel %vm1333_vm7, %v1330_v49, %v1326_v53  ;;  %v1321_v1 = vadd.f32 %v1317_v9, %v1290_v26  ;;  %v1322_v22 = vadd.f32 %v1318_v6, %v1291_v52 }
  0xff   :  { %v1328_v57 = vpop.permute.xlu1 %1327  ;;  %v1292_v29 = vadd.f32 %v1288_v23, %v1261_v41  ;;  %v1293_v32 = vadd.f32 %v1289_v7, %v1262_v42  ;;  %v1351_v35 = vmul.f32 %v1344_v25, %v1334_v61  ;;  %v1352_v0 = vmul.f32 %v1348_v15, %v1336_v24 }
 0x101   :  { %v1365_v19 = vrot.slane %v1351_v35, %v1802_v44  ;;  %v1369_v8 = vrot.slane %v1352_v0, %v1802_v44  ;;  %v1396_v12 = vrot.slane %v1351_v35, %v1805_v45  ;;  %v1400_v34 = vrot.slane %v1352_v0, %v1805_v45  ;;  %v1391_v18 = vpop.permute.xlu0 %1390 }
 0x102   :  { %v1323_v37 = vadd.f32 %v1319_v31, %v1292_v29  ;;  %v1324_v36 = vadd.f32 %v1320_v33, %v1293_v32  ;;  %v1458_v4 = vrot.slane %v1351_v35, %v1856_v13  ;;  %v1462_v53 = vrot.slane %v1352_v0, %v1856_v13 }
 0x103   :  { %v1332_v17 = vpop.permute.xlu1 %1331  ;;  %v1378_v58 = vmul.f32 %v1365_v19, %v1360_v10  ;;  %v1379_v48 = vmul.f32 %v1369_v8, %v1360_v10  ;;  %v1409_v27 = vmul.f32 %v1396_v12, %v1391_v18  ;;  %v1410_v11 = vmul.f32 %v1400_v34, %v1391_v18  ;;  %v1582_v34 = vld [vmem:[%s2406_s0] sm:$0xff] }
 0x104   :  { %v1335_v47 = vsel %vm1333_vm7, %v1328_v57, %v1332_v17  ;;  %v1337_v43 = vsel %vm1333_vm7, %v1332_v17, %v1328_v57  ;;  %v1427_v5 = vrot.slane %v1351_v35, %v1832_v2  ;;  %v1431_v59 = vrot.slane %v1352_v0, %v1832_v2 }
 0x105   :  { %v1353_v50 = vmul.f32 %v1344_v25, %v1335_v47  ;;  %v1354_v20 = vmul.f32 %v1348_v15, %v1337_v43  ;;  %v1382_v54 = vadd.f32 %v1378_v58, %v1321_v1  ;;  %v1383_v14 = vadd.f32 %v1379_v48, %v1322_v22  ;;  %v1453_v15 = vpop.permute.xlu0 %1452 }
 0x106   :  { %v1471_v24 = vmul.f32 %v1458_v4, %v1453_v15  ;;  %v1472_v57 = vmul.f32 %v1462_v53, %v1453_v15  ;;  %v1499_v35 = vsub.s32 %v1496_v63, %v1792_v39  ;;  %v1583_v39 = vld [vmem:[%s2406_s0 + $0x8] sm:$0xff] }
 0x107   :  { %v1373_v60 = vrot.slane %v1353_v50, %v1802_v44  ;;  %v1377_v62 = vrot.slane %v1354_v20, %v1802_v44  ;;  %v1404_v46 = vrot.slane %v1353_v50, %v1805_v45  ;;  %v1408_v40 = vrot.slane %v1354_v20, %v1805_v45  ;;  %v1422_v38 = vpop.permute.xlu1 %1421 }
 0x108   :  { %v1413_v55 = vadd.f32 %v1409_v27, %v1382_v54  ;;  %v1414_v56 = vadd.f32 %v1410_v11, %v1383_v14  ;;  %v1466_v49 = vrot.slane %v1353_v50, %v1856_v13  ;;  %v1470_v3 = vrot.slane %v1354_v20, %v1856_v13 }
 0x109   :  { %v1380_v51 = vmul.f32 %v1373_v60, %v1360_v10  ;;  %v1381_v25 = vmul.f32 %v1377_v62, %v1360_v10  ;;  %v1411_v16 = vmul.f32 %v1404_v46, %v1391_v18  ;;  %v1412_v44 = vmul.f32 %v1408_v40, %v1391_v18 }
 0x10a   :  { %v1435_v41 = vrot.slane %v1353_v50, %v1832_v2  ;;  %v1439_v45 = vrot.slane %v1354_v20, %v1832_v2  ;;  %v1440_v7 = vmul.f32 %v1427_v5, %v1422_v38  ;;  %v1441_v61 = vmul.f32 %v1431_v59, %v1422_v38 }
 0x10b   :  { %v1384_v42 = vadd.f32 %v1380_v51, %v1323_v37  ;;  %v1385_v23 = vadd.f32 %v1381_v25, %v1324_v36  ;;  %v1473_v32 = vmul.f32 %v1466_v49, %v1453_v15  ;;  %v1474_v13 = vmul.f32 %v1470_v3, %v1453_v15  ;;  %v1493_v31 = vpop.permute.xlu1 %1492 }
 0x10c   :  { %v1442_v28 = vmul.f32 %v1435_v41, %v1422_v38  ;;  %v1443_v30 = vmul.f32 %v1439_v45, %v1422_v38  ;;  %v1444_v52 = vadd.f32 %v1440_v7, %v1413_v55  ;;  %v1445_v29 = vadd.f32 %v1441_v61, %v1414_v56 }
 0x10d   :  { %v1415_v10 = vadd.f32 %v1411_v16, %v1384_v42  ;;  %v1416_v26 = vadd.f32 %v1412_v44, %v1385_v23  ;;  %v1500_v1 = vrot.slane %v1493_v31, %v1499_v35 }
 0x10e   :  { %v1475_v9 = vadd.f32 %v1471_v24, %v1444_v52  ;;  %v1476_v6 = vadd.f32 %v1472_v57, %v1445_v29 }
 0x10f   :  { %v1446_v0 = vadd.f32 %v1442_v28, %v1415_v10  ;;  %v1447_v2 = vadd.f32 %v1443_v30, %v1416_v26 }
 0x110   :  { %v1483_v8 = vcombine.low %v1475_v9, %v1476_v6 }
 0x111   :  { %v1477_v33 = vadd.f32 %v1473_v32, %v1446_v0  ;;  %v1478_v19 = vadd.f32 %v1474_v13, %v1447_v2 }
 0x112   :  { %v1487_v17 = vadd.f32 %v1582_v34, %v1483_v8 }
 0x113   :  { %v1484_v12 = vcombine.low %v1477_v33, %v1478_v19 }
 0x114   :  { %v1502_v63 = vadd.f32 %v1500_v1, %v1487_v17 }
 0x115   :  { %v1488_v21 = vadd.f32 %v1583_v39, %v1484_v12 }
 0x116   :  { %1504 = vst [vmem:[#allocation2] sm:$0xff] %v1502_v63 }
 0x117   :  { %v1503_v22 = vadd.f32 %v1500_v1, %v1488_v21 }
 0x119   :  { %1505 = vst [vmem:[#allocation2 + $0x8] sm:$0xff] %v1503_v22 }
 0x11a   :  { %1595 = shalt.err (!%p1592_p4)
}
 0x11b   :  { %s1596_s21 = scalar_lea.hbm %s2410_s4, 256 }
 0x11c   :  { %p1597_p5 = scmp.ne.s32.totalorder %s2410_s4, %s1596_s21  ;;  %p1600_p6 = scmp.lt.u32.totalorder %s1596_s21, %s2410_s4 }
 0x11e   :  { %p1602_p7 = pnand %p1600_p6, %p1597_p5 }
 0x120   :  { %1605 = shalt.err (!%p1602_p7)
}
 0x121   :  { %s1619_s25 = smov 128   ;;  %s1620_s26 = smov 8  }
 0x122   :  { %1517 = dma.vmem_to_hbm [thread:$0]  %s1512_s15, 256, %s2410_s4, [#allocation3], %s1619_s25, %s1619_s25, %s1620_s26  }
 0x123   :  { %1606 = dma.done.wait [#allocation3], 256  }
 0x124   :  { %1607 = vsyncadd [#allocation3], 4294967040 }
 0x125   :  { %1521 = vsyncpa [#allocation3], 1 }

</bundles_post_ra>
